<compile_context>
chip_gen: v5e
topology: v5e:2x2
jax: 0.10.0
libtpu: 0.0.40
codegen_flags: <defaults>
</compile_context>

<pallas_src>
import functools

import jax
import jax.numpy as jnp
from jax import lax
from jax.experimental import pallas as pl
from jax.experimental.pallas import tpu as pltpu

H = 64              # node_hidden_dim
EDGE_HID = 128      # edge_hidden_dim
NODE_IN = 15        # node_input_dim
EDGE_IN = 5         # edge_input_dim
OUT_DIM = 12        # output_dim
NUM_MP = 6          # num_step_message_passing
NUM_S2S = 6         # num_step_set2set
CUTOFF = 5.0        # sys.argv[8] stand-in
GAP = 0.5           # sys.argv[9] stand-in
K_RBF = int(CUTOFF / GAP)            # number of RBF centers
EDGE_FEAT = EDGE_IN + K_RBF - 1      # edge-network input dim (4 raw + K_RBF rbf)


def _round_up(v, m):
    return (v + m - 1) // m * m


def _vmem_limit_bytes():
    # Per-generation scoped-VMEM budget: physical minus headroom
    # (128 MiB on v5e/v6e -> 112 MiB; 64 MiB per-TC on v7x -> 56 MiB).
    try:
        cap = int(pltpu.get_tpu_info().vmem_capacity_bytes)
    except Exception:
        cap = 64 * 1024 * 1024
    return int(min(cap - 8 * 1024 * 1024, 112 * 1024 * 1024))


def _sigmoid(v):
    # sigmoid(x) == 0.5*tanh(0.5*x) + 0.5 ; keeps the transcendental on the EUP slot.
    return 0.5 * jnp.tanh(0.5 * v) + 0.5


# ------------------- kernel 1: RBF + edge network (edge x column tiled) -------------------

def _edge_net_kernel(ea_ref, cent_ref, w1f_ref, w1r_ref, b1_ref, w2_ref, b2_ref,
                     o_ref, *, gap):
    ea = ea_ref[...]                                    # (tE, EDGE_IN)
    feat = ea[:, :EDGE_IN - 1]                          # (tE, 4)  raw edge features
    dist = ea[:, EDGE_IN - 1:EDGE_IN]                   # (tE, 1)  distance column
    diff = dist - cent_ref[...]                         # (tE, K_RBF)
    rbf = jnp.exp(-(diff * diff) / gap)                 # gaussian expansion
    # en1: split weight rows so no concat of the 14-wide feature is needed.
    # (eh recompute per column tile is negligible: 2 column tiles at tn=2048.)
    eh = (jnp.dot(feat, w1f_ref[...], preferred_element_type=jnp.float32)
          + jnp.dot(rbf, w1r_ref[...], preferred_element_type=jnp.float32)
          + b1_ref[...])
    eh = jnp.maximum(eh, 0.0)                           # (tE, EDGE_HID)
    # en2 (dominant matmul): bf16 operands, f32 accumulate, bf16 lane-dense output
    y = jnp.dot(eh.astype(jnp.bfloat16), w2_ref[...],
                preferred_element_type=jnp.float32) + b2_ref[...]
    o_ref[...] = y.astype(jnp.bfloat16)                 # (tE, tn)


def edge_network(edge_attr, centers, w1, b1, w2_bf16, b2, te, tn=2048):
    e_pad = edge_attr.shape[0]
    n2 = w2_bf16.shape[1]
    assert e_pad % te == 0 and n2 % tn == 0
    w1f = w1[:EDGE_IN - 1]          # (4, EDGE_HID)
    w1r = w1[EDGE_IN - 1:]          # (K_RBF, EDGE_HID)
    return pl.pallas_call(
        functools.partial(_edge_net_kernel, gap=GAP),
        out_shape=jax.ShapeDtypeStruct((e_pad, n2), jnp.bfloat16),
        grid=(e_pad // te, n2 // tn),
        in_specs=[
            pl.BlockSpec((te, EDGE_IN), lambda i, j: (i, 0)),
            pl.BlockSpec((1, K_RBF), lambda i, j: (0, 0)),
            pl.BlockSpec((EDGE_IN - 1, EDGE_HID), lambda i, j: (0, 0)),
            pl.BlockSpec((K_RBF, EDGE_HID), lambda i, j: (0, 0)),
            pl.BlockSpec((1, EDGE_HID), lambda i, j: (0, 0)),
            pl.BlockSpec((EDGE_HID, tn), lambda i, j: (0, j)),
            pl.BlockSpec((1, tn), lambda i, j: (0, j)),
        ],
        out_specs=pl.BlockSpec((te, tn), lambda i, j: (i, j)),
        compiler_params=pltpu.CompilerParams(
            dimension_semantics=("parallel", "parallel"),
            vmem_limit_bytes=_vmem_limit_bytes()),
    )(edge_attr, centers.reshape(1, K_RBF), w1f, w1r, b1.reshape(1, EDGE_HID),
      w2_bf16, b2.reshape(1, n2))


# ---------- kernel 2: lin0 + 6 message-passing steps, edge-chunk tiled ----------

def _mp_kernel(x_ref, w0_ref, b0_ref, gsrc_ref, scat_ref, w3d_ref, invdeg_ref,
               bconv_ref, wgru_ref, bgru_ref, o_ref, out_s, agg_s):
    s = pl.program_id(0)            # message-passing step
    c = pl.program_id(1)            # edge chunk
    nc = pl.num_programs(1)

    @pl.when(jnp.logical_and(s == 0, c == 0))
    def _():
        # lin0 + relu; out == h for a single-layer GRU, so one state array suffices.
        out_s[...] = jnp.maximum(
            jnp.dot(x_ref[...], w0_ref[...], preferred_element_type=jnp.float32)
            + b0_ref[...], 0.0)

    @pl.when(c == 0)
    def _():
        agg_s[...] = jnp.zeros_like(agg_s)

    # gather source-node features for this edge chunk: bf16 (tE, N) @ (N, H), f32 acc
    x_src = jnp.dot(gsrc_ref[...], out_s[...].astype(jnp.bfloat16),
                    preferred_element_type=jnp.float32)                  # (tE, H)
    # per-edge message  msg[e, o] = sum_k x_src[e, k] * W[e, k, o]  (bf16 operands)
    # TODO(synk): compare this MXU batched-matvec (M=1) against the VPU formulation
    # jnp.sum(x_src[:, :, None] * w3d, axis=1) on a bundle dump.
    msg = lax.dot_general(x_src.astype(jnp.bfloat16)[:, None, :], w3d_ref[...],
                          (((2,), (1,)), ((0,), (0,))),
                          preferred_element_type=jnp.float32)[:, 0, :]   # (tE, H)
    # scatter-accumulate onto destination nodes: bf16 (N, tE) @ (tE, H), f32 acc
    agg_s[...] += jnp.dot(scat_ref[...], msg.astype(jnp.bfloat16),
                          preferred_element_type=jnp.float32)            # (N, H)

    @pl.when(c == nc - 1)
    def _():
        h = out_s[...]
        # mean aggregation (1/deg in f32) + NNConv bias + relu
        m = jnp.maximum(agg_s[...] * invdeg_ref[...] + bconv_ref[...], 0.0)
        # fused GRU gates: ONE K=2H bf16 matmul; columns = [r | z | n_input | n_hidden]
        mh = jnp.concatenate([m, h], axis=1).astype(jnp.bfloat16)        # (N, 2H)
        g = (jnp.dot(mh, wgru_ref[...], preferred_element_type=jnp.float32)
             + bgru_ref[...])                                            # (N, 4H)
        r = _sigmoid(g[:, 0:H])
        z = _sigmoid(g[:, H:2 * H])
        n = jnp.tanh(g[:, 2 * H:3 * H] + r * g[:, 3 * H:4 * H])
        h_new = (1.0 - z) * n + z * h
        out_s[...] = h_new                   # GRU output == new hidden
        o_ref[...] = h_new


def message_passing(x, w0, b0, gsrc, scat, w3d, inv_deg, conv_b,
                    w_gru_bf16, b_gru, te):
    N = x.shape[0]
    e_pad = w3d.shape[0]
    n_chunks = e_pad // te
    # NOTE: on v5e/v6e (128 MiB VMEM) small graphs could instead keep w3d fully
    # resident across all 6 steps; the tiled form is the v7x-safe, pipelined default.
    return pl.pallas_call(
        _mp_kernel,
        out_shape=jax.ShapeDtypeStruct((N, H), jnp.float32),
        grid=(NUM_MP, n_chunks),
        in_specs=[
            pl.BlockSpec((N, NODE_IN), lambda s, c: (0, 0)),
            pl.BlockSpec((NODE_IN, H), lambda s, c: (0, 0)),
            pl.BlockSpec((1, H), lambda s, c: (0, 0)),
            pl.BlockSpec((te, N), lambda s, c: (c, 0)),        # gather one-hot chunk
            pl.BlockSpec((N, te), lambda s, c: (0, c)),        # scatter one-hot chunk
            pl.BlockSpec((te, H, H), lambda s, c: (c, 0, 0)),  # per-edge weights chunk
            pl.BlockSpec((N, 1), lambda s, c: (0, 0)),
            pl.BlockSpec((1, H), lambda s, c: (0, 0)),
            pl.BlockSpec((2 * H, 4 * H), lambda s, c: (0, 0)),
            pl.BlockSpec((1, 4 * H), lambda s, c: (0, 0)),
        ],
        out_specs=pl.BlockSpec((N, H), lambda s, c: (0, 0)),
        scratch_shapes=[pltpu.VMEM((N, H), jnp.float32),       # out/h state
                        pltpu.VMEM((N, H), jnp.float32)],      # message accumulator
        compiler_params=pltpu.CompilerParams(
            dimension_semantics=("arbitrary", "arbitrary"),
            vmem_limit_bytes=_vmem_limit_bytes()),
    )(x, w0, b0.reshape(1, H), gsrc, scat, w3d, inv_deg, conv_b.reshape(1, H),
      w_gru_bf16, b_gru.reshape(1, 4 * H))


# ------------- kernel 3: fused 6-step Set2Set + lin1/relu + lin2 head -------------

def _s2s_head_kernel(x_ref, memb_ref, wlstm_ref, blstm_ref,
                     w1q_ref, w1r_ref, b1_ref, w2_ref, b2_ref, o_ref):
    x = x_ref[...]                                       # (N, H) node features
    x_b = x.astype(jnp.bfloat16)
    memb = memb_ref[...]                                 # (B, N) graph membership 0/1
    B = memb.shape[0]

    wlstm = wlstm_ref[...]                               # (3H, 4H) stacked [wih_q;wih_r;whh]
    bias = blstm_ref[...]                                # (1, 4H)  bih + bhh

    qq = jnp.zeros((B, H), jnp.float32)                  # q_star = [qq | qr], starts at 0
    qr = jnp.zeros((B, H), jnp.float32)
    hh = jnp.zeros((B, H), jnp.float32)                  # LSTM hidden
    cc = jnp.zeros((B, H), jnp.float32)                  # LSTM cell

    # TODO(synk): for large batched graphs add a graph-tile grid axis (v7x 2-TC sharding).
    for _ in range(NUM_S2S):
        # fused LSTM gates: one K=3H matmul; slice i, f, g, o
        qsh = jnp.concatenate([qq, qr, hh], axis=1)                        # (B, 3H)
        g = jnp.dot(qsh, wlstm, preferred_element_type=jnp.float32) + bias  # (B, 4H)
        gi = _sigmoid(g[:, 0:H])
        gf = _sigmoid(g[:, H:2 * H])
        gg = jnp.tanh(g[:, 2 * H:3 * H])
        go = _sigmoid(g[:, 3 * H:4 * H])
        cc = gf * cc + gi * gg
        hh = go * jnp.tanh(cc)                           # LSTM output == new hidden
        q = hh                                           # (B, H)

        # attention over nodes, masked per-graph softmax (bf16 score matmul)
        e = lax.dot_general(q.astype(jnp.bfloat16), x_b, (((1,), (1,)), ((), ())),
                            preferred_element_type=jnp.float32)          # (B, N)
        e = jnp.where(memb > 0.5, e, -1e30)
        e_max = jnp.max(e, axis=1, keepdims=True)
        p = jnp.exp(e - e_max) * memb
        denom = jnp.maximum(jnp.sum(p, axis=1, keepdims=True), 1e-20)    # NaN guard
        a = p * pl.reciprocal(denom, approx=True)
        r = jnp.dot(a, x, preferred_element_type=jnp.float32)            # (B, H) readout
        qq, qr = q, r

    # lin1 (on q_star = [qq | qr], weight pre-split row-wise) + relu, then lin2
    y = jnp.maximum(jnp.dot(qq, w1q_ref[...], preferred_element_type=jnp.float32)
                    + jnp.dot(qr, w1r_ref[...], preferred_element_type=jnp.float32)
                    + b1_ref[...], 0.0)                                  # (B, H)
    y = jnp.dot(y, w2_ref[...], preferred_element_type=jnp.float32) + b2_ref[...]
    o_ref[...] = y                                                       # (B, OUT_DIM)


def set2set_head(out, memb, w_lstm, b_lstm, w1, b1, w2, b2):
    B = memb.shape[0]
    return pl.pallas_call(
        _s2s_head_kernel,
        out_shape=jax.ShapeDtypeStruct((B, OUT_DIM), jnp.float32),
        compiler_params=pltpu.CompilerParams(vmem_limit_bytes=_vmem_limit_bytes()),
    )(out, memb, w_lstm, b_lstm.reshape(1, 4 * H), w1[:H], w1[H:],
      b1.reshape(1, H), w2, b2.reshape(1, OUT_DIM))


# --------------------------- parameters & forward ----------------------------

def init_params(key):
    ks = jax.random.split(key, 11)

    def lin(k, fan_in, fan_out):
        kw, kb = jax.random.split(k)
        bound = 1.0 / jnp.sqrt(jnp.float32(fan_in))
        w = jax.random.uniform(kw, (fan_in, fan_out), jnp.float32, -bound, bound)
        b = jax.random.uniform(kb, (fan_out,), jnp.float32, -bound, bound)
        return w, b

    p = {}
    p["lin0_w"], p["lin0_b"] = lin(ks[0], NODE_IN, H)
    p["en1_w"], p["en1_b"] = lin(ks[1], EDGE_FEAT, EDGE_HID)
    p["en2_w"], p["en2_b"] = lin(ks[2], EDGE_HID, H * H)
    p["conv_b"] = jax.random.uniform(ks[3], (H,), jnp.float32, -0.1, 0.1)   # NNConv bias
    # GRU (stored transposed [in, 3H]; gate order r, z, n as in PyTorch)
    p["gru_wih"], p["gru_bih"] = lin(ks[4], H, 3 * H)
    p["gru_whh"], p["gru_bhh"] = lin(ks[5], H, 3 * H)
    # Set2Set LSTM (input 2H -> hidden H; gate order i, f, g, o as in PyTorch)
    p["s2s_wih"], p["s2s_bih"] = lin(ks[6], 2 * H, 4 * H)
    p["s2s_whh"], p["s2s_bhh"] = lin(ks[7], H, 4 * H)
    p["lin1_w"], p["lin1_b"] = lin(ks[8], 2 * H, H)
    p["lin2_w"], p["lin2_b"] = lin(ks[9], H, OUT_DIM)
    return p


def mpnn_rbf_forward(p, x, edge_index, edge_attr, batch, num_graphs, te=256):
    N = x.shape[0]
    E = edge_index.shape[1]
    te = min(te, _round_up(E, 8))        # small graphs: single full-E chunk
    e_pad = _round_up(E, te)             # te is a multiple of 128 whenever e_pad > te
    pad = e_pad - E

    # edge network -> per-edge (H, H) weights (same every MP step, compute once), bf16
    edge_attr_p = jnp.pad(edge_attr, ((0, pad), (0, 0)))
    centers = jnp.arange(K_RBF, dtype=jnp.float32) * GAP
    w_flat = edge_network(edge_attr_p, centers, p["en1_w"], p["en1_b"],
                          p["en2_w"].astype(jnp.bfloat16), p["en2_b"], te)
    w3d = w_flat.reshape(e_pad, H, H)                             # (E_pad, H_in, H_out)

    # sparse-structure glue: bf16 one-hot gather/scatter (exact 0/1), padded edges masked
    # TODO(synk): for very large N, replace with scalar-prefetched index gather/scatter.
    src, dst = edge_index[0], edge_index[1]
    valid = (jnp.arange(e_pad) < E).astype(jnp.float32)
    src_p = jnp.pad(src, (0, pad))
    dst_p = jnp.pad(dst, (0, pad))
    gsrc = (jax.nn.one_hot(src_p, N, dtype=jnp.float32)
            * valid[:, None]).astype(jnp.bfloat16)                # (E_pad, N)
    scat = (jax.nn.one_hot(dst_p, N, dtype=jnp.float32)
            * valid[:, None]).T.astype(jnp.bfloat16)              # (N, E_pad)
    deg = jnp.maximum(jnp.zeros((N,), jnp.float32).at[dst].add(1.0), 1.0)
    inv_deg = (1.0 / deg).reshape(N, 1)                           # f32 mean scaling

    # stack GRU weights for one fused K=2H gate matmul; n-gate kept separable:
    # columns = [ r | z | n_input-part | n_hidden-part ]
    wih, whh = p["gru_wih"], p["gru_whh"]
    w_gru = jnp.zeros((2 * H, 4 * H), jnp.float32)
    w_gru = w_gru.at[0:H, 0:2 * H].set(wih[:, 0:2 * H])               # W_ir | W_iz
    w_gru = w_gru.at[0:H, 2 * H:3 * H].set(wih[:, 2 * H:3 * H])       # W_in
    w_gru = w_gru.at[H:2 * H, 0:2 * H].set(whh[:, 0:2 * H])           # W_hr | W_hz
    w_gru = w_gru.at[H:2 * H, 3 * H:4 * H].set(whh[:, 2 * H:3 * H])   # W_hn
    b_gru = jnp.concatenate([p["gru_bih"][0:2 * H] + p["gru_bhh"][0:2 * H],
                             p["gru_bih"][2 * H:3 * H],
                             p["gru_bhh"][2 * H:3 * H]])

    # fused lin0 + 6 message-passing steps (edge-chunk tiled, pipelined)
    out = message_passing(x, p["lin0_w"], p["lin0_b"], gsrc, scat, w3d, inv_deg,
                          p["conv_b"], w_gru.astype(jnp.bfloat16), b_gru, te)

    # fused Set2Set (6 steps) + lin1/relu + lin2; LSTM gate weights pre-stacked (3H, 4H)
    memb = jax.nn.one_hot(batch, num_graphs, dtype=jnp.float32).T     # (B, N)
    w_lstm = jnp.concatenate([p["s2s_wih"], p["s2s_whh"]], axis=0)    # (3H, 4H)
    b_lstm = p["s2s_bih"] + p["s2s_bhh"]
    y = set2set_head(out, memb, w_lstm, b_lstm, p["lin1_w"], p["lin1_b"],
                     p["lin2_w"], p["lin2_b"])
    return y


# ------------------------------- main ----------------------------------------

if __name__ == "__main__":
    key = jax.random.PRNGKey(0)
    kp, kx, ke, ka = jax.random.split(key, 4)
    params = init_params(kp)

    N, E, B = 8, 24, 2
    x = jax.random.normal(kx, (N, NODE_IN), jnp.float32)
    src = jax.random.randint(ke, (E,), 0, N, dtype=jnp.int32)
    dst = jax.random.randint(jax.random.fold_in(ke, 1), (E,), 0, N, dtype=jnp.int32)
    edge_index = jnp.stack([src, dst], axis=0)                             # (2, E)
    feat = jax.random.normal(ka, (E, EDGE_IN - 1), jnp.float32)
    dist = jax.random.uniform(jax.random.fold_in(ka, 1), (E, 1), jnp.float32, 0.0, CUTOFF)
    edge_attr = jnp.concatenate([feat, dist], axis=1)                      # (E, EDGE_IN)
    batch = jnp.concatenate([jnp.zeros(N // 2, jnp.int32),
                             jnp.ones(N - N // 2, jnp.int32)])             # (N,)

    y = mpnn_rbf_forward(params, x, edge_index, edge_attr, batch, num_graphs=B)
    y = jax.block_until_ready(y)
    assert y.shape == (B, OUT_DIM) and jnp.all(jnp.isfinite(y))
    print("KERNEL_OK")
</pallas_src>

<mosaic_0001>
module attributes {stable_mosaic.version = 11 : i64} {
  func.func @_edge_net_kernel(%arg0: i32, %arg1: i32, %arg2: memref<24x5xf32, #tpu.memory_space<vmem>>, %arg3: memref<1x10xf32, #tpu.memory_space<vmem>>, %arg4: memref<4x128xf32, #tpu.memory_space<vmem>>, %arg5: memref<10x128xf32, #tpu.memory_space<vmem>>, %arg6: memref<1x128xf32, #tpu.memory_space<vmem>>, %arg7: memref<128x2048xbf16, #tpu.memory_space<vmem>>, %arg8: memref<1x2048xf32, #tpu.memory_space<vmem>>, %arg9: memref<24x2048xbf16, #tpu.memory_space<vmem>>) attributes {dimension_semantics = [#tpu.dimension_semantics<parallel>, #tpu.dimension_semantics<parallel>], iteration_bounds = array<i64: 1, 2>, scalar_prefetch = 0 : i64, scratch_operands = 0 : i64, tpu.core_type = #tpu.core_type<tc>, window_params = [{transform_indices = @transform_0, window_bounds = array<i64: 24, 5>}, {pipeline_mode = #tpu.pipeline_mode<synchronous>, transform_indices = @transform_1, window_bounds = array<i64: 1, 10>}, {pipeline_mode = #tpu.pipeline_mode<synchronous>, transform_indices = @transform_2, window_bounds = array<i64: 4, 128>}, {pipeline_mode = #tpu.pipeline_mode<synchronous>, transform_indices = @transform_3, window_bounds = array<i64: 10, 128>}, {pipeline_mode = #tpu.pipeline_mode<synchronous>, transform_indices = @transform_4, window_bounds = array<i64: 1, 128>}, {transform_indices = @transform_5, window_bounds = array<i64: 128, 2048>}, {transform_indices = @transform_6, window_bounds = array<i64: 1, 2048>}, {transform_indices = @transform_7, window_bounds = array<i64: 24, 2048>}]} {
    %c0 = arith.constant 0 : index
    %c0_0 = arith.constant 0 : index
    %0 = vector.load %arg2[%c0, %c0_0] : memref<24x5xf32, #tpu.memory_space<vmem>>, vector<24x5xf32>
    %1 = vector.extract_strided_slice %0 {offsets = [0, 0], sizes = [24, 4], strides = [1, 1]} : vector<24x5xf32> to vector<24x4xf32>
    %2 = vector.extract_strided_slice %0 {offsets = [0, 4], sizes = [24, 1], strides = [1, 1]} : vector<24x5xf32> to vector<24x1xf32>
    %c0_1 = arith.constant 0 : index
    %c0_2 = arith.constant 0 : index
    %3 = vector.load %arg3[%c0_1, %c0_2] : memref<1x10xf32, #tpu.memory_space<vmem>>, vector<1x10xf32>
    %4 = vector.broadcast %2 : vector<24x1xf32> to vector<24x10xf32>
    %5 = vector.broadcast %3 : vector<1x10xf32> to vector<24x10xf32>
    %6 = arith.subf %4, %5 : vector<24x10xf32>
    %7 = arith.mulf %6, %6 : vector<24x10xf32>
    %cst = arith.constant 0.000000e+00 : f32
    %8 = vector.broadcast %cst : f32 to vector<24x10xf32>
    %9 = arith.subf %8, %7 : vector<24x10xf32>
    %cst_3 = arith.constant 5.000000e-01 : f32
    %10 = vector.broadcast %cst_3 : f32 to vector<24x10xf32>
    %11 = arith.divf %9, %10 : vector<24x10xf32>
    %12 = math.exp %11 : vector<24x10xf32>
    %c0_4 = arith.constant 0 : index
    %c0_5 = arith.constant 0 : index
    %13 = vector.load %arg4[%c0_4, %c0_5] : memref<4x128xf32, #tpu.memory_space<vmem>>, vector<4x128xf32>
    %cst_6 = arith.constant dense<0.000000e+00> : vector<24x128xf32>
    %14 = tpu.matmul %1, %13, %cst_6 {dimension_numbers = #tpu.dot_dimension_numbers<[1], [0], [0], [1], [0, 0, 1, 1], [], []>} : vector<24x4xf32>, vector<4x128xf32>, vector<24x128xf32> -> vector<24x128xf32>
    %c0_7 = arith.constant 0 : index
    %c0_8 = arith.constant 0 : index
    %15 = vector.load %arg5[%c0_7, %c0_8] : memref<10x128xf32, #tpu.memory_space<vmem>>, vector<10x128xf32>
    %cst_9 = arith.constant dense<0.000000e+00> : vector<24x128xf32>
    %16 = tpu.matmul %12, %15, %cst_9 {dimension_numbers = #tpu.dot_dimension_numbers<[1], [0], [0], [1], [0, 0, 1, 1], [], []>} : vector<24x10xf32>, vector<10x128xf32>, vector<24x128xf32> -> vector<24x128xf32>
    %17 = arith.addf %14, %16 : vector<24x128xf32>
    %c0_10 = arith.constant 0 : index
    %c0_11 = arith.constant 0 : index
    %18 = vector.load %arg6[%c0_10, %c0_11] : memref<1x128xf32, #tpu.memory_space<vmem>>, vector<1x128xf32>
    %19 = vector.broadcast %18 : vector<1x128xf32> to vector<24x128xf32>
    %20 = arith.addf %17, %19 : vector<24x128xf32>
    %cst_12 = arith.constant 0.000000e+00 : f32
    %21 = vector.broadcast %cst_12 : f32 to vector<24x128xf32>
    %22 = arith.maximumf %20, %21 : vector<24x128xf32>
    %23 = arith.truncf %22 : vector<24x128xf32> to vector<24x128xbf16>
    %c0_13 = arith.constant 0 : index
    %c0_14 = arith.constant 0 : index
    %24 = vector.load %arg7[%c0_13, %c0_14] : memref<128x2048xbf16, #tpu.memory_space<vmem>>, vector<128x2048xbf16>
    %cst_15 = arith.constant dense<0.000000e+00> : vector<24x2048xf32>
    %25 = tpu.matmul %23, %24, %cst_15 {dimension_numbers = #tpu.dot_dimension_numbers<[1], [0], [0], [1], [0, 0, 1, 1], [], []>} : vector<24x128xbf16>, vector<128x2048xbf16>, vector<24x2048xf32> -> vector<24x2048xf32>
    %c0_16 = arith.constant 0 : index
    %c0_17 = arith.constant 0 : index
    %26 = vector.load %arg8[%c0_16, %c0_17] : memref<1x2048xf32, #tpu.memory_space<vmem>>, vector<1x2048xf32>
    %27 = vector.broadcast %26 : vector<1x2048xf32> to vector<24x2048xf32>
    %28 = arith.addf %25, %27 : vector<24x2048xf32>
    %29 = arith.truncf %28 : vector<24x2048xf32> to vector<24x2048xbf16>
    %c0_18 = arith.constant 0 : index
    %c0_19 = arith.constant 0 : index
    %30 = vector.load %arg9[%c0_18, %c0_19] : memref<24x2048xbf16, #tpu.memory_space<vmem>>, vector<24x2048xbf16>
    tpu.vector_store %arg9[%c0_18, %c0_19], %29 {strides = array<i32>} : memref<24x2048xbf16, #tpu.memory_space<vmem>>, vector<24x2048xbf16>,
    return
  }
  func.func @transform_0(%arg0: i32, %arg1: i32) -> (i32, i32) {
    %c0_i32 = arith.constant 0 : i32
    %c0_i32_0 = arith.constant 0 : i32
    return %arg0, %c0_i32 : i32, i32
  }
  func.func @transform_1(%arg0: i32, %arg1: i32) -> (i32, i32) {
    %c0_i32 = arith.constant 0 : i32
    %c0_i32_0 = arith.constant 0 : i32
    %c0_i32_1 = arith.constant 0 : i32
    return %c0_i32, %c0_i32_0 : i32, i32
  }
  func.func @transform_2(%arg0: i32, %arg1: i32) -> (i32, i32) {
    %c0_i32 = arith.constant 0 : i32
    %c0_i32_0 = arith.constant 0 : i32
    %c0_i32_1 = arith.constant 0 : i32
    return %c0_i32, %c0_i32_0 : i32, i32
  }
  func.func @transform_3(%arg0: i32, %arg1: i32) -> (i32, i32) {
    %c0_i32 = arith.constant 0 : i32
    %c0_i32_0 = arith.constant 0 : i32
    %c0_i32_1 = arith.constant 0 : i32
    return %c0_i32, %c0_i32_0 : i32, i32
  }
  func.func @transform_4(%arg0: i32, %arg1: i32) -> (i32, i32) {
    %c0_i32 = arith.constant 0 : i32
    %c0_i32_0 = arith.constant 0 : i32
    %c0_i32_1 = arith.constant 0 : i32
    return %c0_i32, %c0_i32_0 : i32, i32
  }
  func.func @transform_5(%arg0: i32, %arg1: i32) -> (i32, i32) {
    %c0_i32 = arith.constant 0 : i32
    %c0_i32_0 = arith.constant 0 : i32
    return %c0_i32, %arg1 : i32, i32
  }
  func.func @transform_6(%arg0: i32, %arg1: i32) -> (i32, i32) {
    %c0_i32 = arith.constant 0 : i32
    %c0_i32_0 = arith.constant 0 : i32
    return %c0_i32, %arg1 : i32, i32
  }
  func.func @transform_7(%arg0: i32, %arg1: i32) -> (i32, i32) {
    %c0_i32 = arith.constant 0 : i32
    return %arg0, %arg1 : i32, i32
  }
}

</mosaic_0001>

<bundles_post_ra>
// kernel: tpu_custom_call.1
= control target key start
LH: loop header
LB: loop body
LE: loop exit
PB: predicated region body
PF: predicated region fallthrough
CT: control target
= control target key end

     0   :  { %s3335_s0 = inlined_call_operand.vmem [shape: f32[24,5], index: 0, kind: input, shape index: {}]   ;;  %s3336_s1 = inlined_call_operand.vmem [shape: f32[1,10], index: 1, kind: input, shape index: {}]   ;;  %s3337_s2 = inlined_call_operand.vmem [shape: f32[4,128], index: 2, kind: input, shape index: {}]   ;;  %s3338_s3 = inlined_call_operand.hbm [shape: f32[10,128], index: 3, kind: input, shape index: {}]   ;;  %s3339_s4 = inlined_call_operand.hbm [shape: f32[1,128], index: 4, kind: input, shape index: {}]   ;;  %s3340_s5 = inlined_call_operand.hbm [shape: bf16[128,4096], index: 5, kind: input, shape index: {}]   ;;  %s3341_s6 = inlined_call_operand.vmem [shape: f32[1,4096], index: 6, kind: input, shape index: {}]   ;;  %s3342_s7 = inlined_call_operand.hbm [shape: bf16[24,4096], index: 7, kind: output, shape index: {}]  }
   0x1   :  { %3350 = sst [smem:[#allocation17_spill]] %s3338_s3 }
   0x2   :  { %3351 = sst [smem:[#allocation18_spill]] %s3339_s4 }
   0x3   :  { %3352 = sst [smem:[#allocation19_spill]] %s3342_s7 }
   0x4   :  { %12 = vsyncpa [#allocation3], 0 }
   0x5   :  { %13 = vsyncpa [#allocation6], 0 }
   0x6   :  { %14 = vsyncpa [#allocation4], 0 }
   0x7   :  { %16 = vsyncpa [#allocation4 + $0x1], 0  ;;  %s2820_s24 = smov 0   ;;  %s2822_s25 = smov 0  }
   0x8   :  { %s2824_s26 = smov 0   ;;  %s2826_s27 = smov 0  }
   0x9   :  { %s2828_s28 = smov 0   ;;  %s2830_s29 = smov 0  }
   0xa LB: > { %3353 = sst [smem:[#allocation13_spill]] %s2746_s24  ;;  %s2851_s30 = sadd.s32 4294967295, %s2766_s29   ;;  %s2766_s29 = sphi %s2830_s29, %s22_s29   ;;  %s2762_s28 = sphi %s2828_s28, %s3374_s28   ;;  %s2758_s27 = sphi %s2826_s27, %s3373_s27   ;;  %s2754_s26 = sphi %s2824_s26, %s3372_s26   ;;  %s2750_s25 = sphi %s2822_s25, %s3371_s25   ;;  %s2746_s24 = sphi %s2820_s24, %s3370_s24  }
   0xb   : > { %3354 = sst [smem:[#allocation14_spill]] %s2766_s29  ;;  %s1812_s8 = sadd.s32 4294967294, %s2766_s29  }
   0xc   : > { %p158_p0 = scmp.ne.s32.totalorder %s2754_s26, %s2750_s25  ;;  %p159_p1 = scmp.eq.s32.totalorder %s2766_s29, 0 }
   0xd   : > { %p164_p2 = scmp.ne.s32.totalorder %s2750_s25, %s2746_s24  ;;  %p165_p3 = scmp.eq.s32.totalorder %s2851_s30, 0 }
   0xe   : > { %p2860_p4 = por %p159_p1, %p158_p0  ;;  %p216_p5 = scmp.eq.s32.totalorder %s2851_s30, 1 }
   0xf   : > { %p2867_p6 = por %p165_p3, %p164_p2  ;;  %p222_p7 = scmp.eq.s32.totalorder %s1812_s8, 1 }
  0x10   : > { %p2871_p8 = por %p216_p5, %p158_p0  ;;  %p1813_p9 = scmp.ge.s32.totalorder %s2766_s29, 1 }
  0x11   : > { %p2876_p10 = por %p222_p7, %p164_p2  ;;  %p229_p11 = scmp.lt.s32.totalorder %s2766_s29, 3 }
  0x12   : > { %s3357_s11 = scalar_select %p2871_p8, 1, 0 }
  0x13   : > { %s3359_s12 = scalar_select %p2876_p10, 1, 0 }
  0x14   : > { %3358 = sst [smem:[#allocation15_spill]] %s3357_s11  ;;  %p2884_p12 = pnand %p1813_p9, %p229_p11 }
  0x15   : > { %3360 = sst [smem:[#allocation16_spill]] %s3359_s12  ;;  %s2768_s17 = smov [#allocation2]  }
  0x16   : > { %s3361_s3 = sld [smem:[#allocation17_spill]]  ;;  %p2493_p13 = pneg %p2884_p12 }
  0x17   : > { %s257_s18 = sshll.u32 %s2768_s17, 4  ;;  %p1817_p1 = scmp.ge.s32.totalorder %s2766_s29, 2  ;;  %s258_s18 = int_to_ptr.vmem [resolvable:$true] %s257_s18 }
  0x18   : > { %p2494_p0 = pnand %p2493_p13, %p165_p3  ;;  %p2510_p2 = scmp.lt.s32.totalorder %s2766_s29, 2 }
  0x19   : > { %s3363_s4 = sld [smem:[#allocation18_spill]]  ;;  %s2769_s22 = smov 128  }
  0x1a   : > { %s2770_s23 = smov 8   ;;  %p2899_p5 = pnand %p2510_p2, %p2860_p4 }
  0x1b   : > { %s2771_s13 = smov [#allocation5]   ;;  %s151_s17 = sadd.s32 1, %s2754_s26 }
  0x1c   : > { %s255_s15 = sshll.u32 %s3361_s3, 4  ;;  %s272_s14 = sshll.u32 %s2771_s13, 4  ;;  %s256_s15 = int_to_ptr.hbm [resolvable:$true] %s255_s15  ;;  %s273_s14 = int_to_ptr.vmem [resolvable:$true] %s272_s14 }
  0x1d   : > { %2496 = dma.hbm_to_vmem [thread:$0]  (!%p2494_p0), %s256_s15, 256, %s258_s18, [#allocation3], %s2769_s22, %s2769_s22, %s2770_s23  }
  0x1e   : > { %s31_s3 = sadd.s32 1, %s2762_s28  ;;  %s283_s19 = sand.u32 1, %s2766_s29  }
  0x1f   : > { %s270_s21 = sshll.u32 %s3363_s4, 4  ;;  %p32_p7 = scmp.ge.s32.totalorder %s31_s3, 2  ;;  %s271_s21 = int_to_ptr.hbm [resolvable:$true] %s270_s21 }
  0x20   : > { %2499 = dma.hbm_to_vmem [thread:$0]  (!%p2494_p0), %s271_s21, 16, %s273_s14, [#allocation6]  }
  0x21   : > { %s285_s20 = sand.u32 1, %s2754_s26   ;;  %s2350_s4 = sshll.u32 %s2762_s28, 6 }
  0x22   : > { %s3376_s3 = smov (%p32_p7, %s31_s3), 0  ;;  %s1818_s9 = sshll.u32 %s285_s20, 10 }
  0x23   : > { %s292_s22 = scalar_lea.hbm %s3340_s5, %s2350_s4  ;;  %s148_s23 = ssub.s32 %s2762_s28, %s3376_s3 }
  0x24   : > { %p149_p4 = scmp.eq.s32.totalorder %s148_s23, 0  ;;  %s293_s13 = sshll.u32 %s292_s22, 4  ;;  %s294_s13 = int_to_ptr.hbm [resolvable:$true] %s293_s13 }
  0x25   : > { %s287_s21 = scalar_lea.vmem [#allocation7], %s1818_s9  ;;  %s284_s29 = scalar_lea.sflag [#allocation3], %s283_s19 }
  0x26   : > { %s295_s14 = sshll.u32 %s287_s21, 4  ;;  %s2772_s24 = smov 2048   ;;  %s296_s14 = int_to_ptr.vmem [resolvable:$true] %s295_s14 }
  0x27   : > { %s2916_s12 = scalar_select %p149_p4, %s2754_s26, %s151_s17  }
  0x28   : > { %s2773_s11 = smov 1024   ;;  %s2774_s7 = smov 64  }
  0x29   : > { %2503 = dma.hbm_to_vmem [thread:$0]  (!%p2899_p5), %s294_s13, 16384, %s296_s14, %s284_s29, %s2772_s24, %s2773_s11, %s2774_s7  }
  0x2a   : > { %315 = sbr.rel (%p2884_p12) target bundleno = 583 (0x247), region = 48 }
  0x2f   : > { %2729 = dma.done.wait (%p165_p3), [#allocation3], 256  }
  0x30   : > { %2731 = vsyncadd (%p165_p3), [#allocation3], 4294967040 }
  0x31   : > { %2733 = dma.done.wait (%p165_p3), [#allocation6], 16  }
  0x32   : > { %2735 = vsyncadd (%p165_p3), [#allocation6], 4294967280  ;;  %s327_s4 = sand.u32 1, %s2851_s30   ;;  %s2932_s7 = sand.u32 1, %s2750_s25  }
  0x33   : > { %s1824_s24 = sshll.u32 %s2932_s7, 10  ;;  %s328_s29 = scalar_lea.sflag [#allocation3], %s327_s4 }
  0x34   : > { %s2935_s11 = scalar_lea.vmem [#allocation7], %s1824_s24 }
  0x35   : > { %2737 = dma.done.wait (%p2867_p6), %s328_s29, 16384  }
  0x36   : > { %2739 = vsyncadd (%p2867_p6), %s328_s29, 4294950912  ;;  %v2775_v0 = vmov 4   ;;  %v386_v1 = vld [vmem:[%s3335_s0] sm:$0xff]  ;;  %v388_v2 = vld [vmem:[%s3335_s0 + $0x10] sm:$0xff]  ;;  %v2776_v4 = vmov 0.5   ;;  %vm446_vm0 = vcmask 1041408  }
  0x37   : > { %2574 = vset.pattern.permute.xlu0 %v2775_v0  ;;  %2575 = vset.pattern.permute.xlu1 %v2775_v0  ;;  %v387_v3 = vld [vmem:[%s3335_s0 + $0x8] sm:$0xff]  ;;  %2578 = vrcp.f32 %v2776_v4  ;;  %v434_v6 = vld [vmem:[#allocation2] sm:$0xff]  ;;  %vm483_vm1 = vcmask 1043456   ;;  %vm476_vm2 = vcmask 31744   ;;  %v2284_v17 = vld [vmem:[%s2935_s11 + $0x380] sm:$0xf] }
  0x38   : > { %392 = vperm.xlu0 %2574, %v386_v1   ;;  %402 = vperm.xlu1 %2575, %v388_v2   ;;  %v435_v5 = vld [vmem:[#allocation2 + $0x8] sm:$0x3]  ;;  %v433_v7 = vld [vmem:[%s3337_s2] sm:$0xf]  ;;  %v2471_v18 = vld [vmem:[%s2935_s11 + $0x3bc] sm:$0xf0] }
  0x39   : > { %1826 = vmatpush.msk.msra.mxu0 %vm446_vm0, %v435_v5  ;;  %1830 = vmatpush.msk.msra.mxu1 %vm483_vm1, %v433_v7  ;;  %v2576_v12 = vld [vmem:[%s3336_s1] ss:$0 sm:$0xff]  ;;  %v2463_v19 = vld [vmem:[%s2935_s11 + $0x384] sm:$0xf]  ;;  %v2285_v21 = vor.u32 %v2471_v18, %v2284_v17  ;;  %v2292_v23 = vld [vmem:[%s2935_s11 + $0x388] sm:$0xf] }
  0x3a   : > { %1831 = vmatmul.msk.f32.vlgmr.msra.gmra.mxu1 %vm476_vm2, %v386_v1  ;;  %v2286_v22 = vld [vmem:[%s2935_s11 + $0x3c0] sm:$0xf0]  ;;  %v2472_v24 = vld [vmem:[%s2935_s11 + $0x3c4] sm:$0xf0]  ;;  %v2464_v28 = vld [vmem:[%s2935_s11 + $0x38c] sm:$0xf] }
  0x3b   : > { %465 = vmatpush.msra.mxu0 %v434_v6  ;;  %v2289_v26 = vor.u32 %v2463_v19, %v2286_v22  ;;  %v2293_v27 = vor.u32 %v2472_v24, %v2292_v23  ;;  %v2294_v29 = vld [vmem:[%s2935_s11 + $0x3c8] sm:$0xf0]  ;;  %v2220_v30 = vld [vmem:[%s2935_s11 + $0x300] sm:$0xf]  ;;  %1329 = vmatpush.bf16.msra.mxu2 %v2285_v21  ;;  %v2447_v35 = vld [vmem:[%s2935_s11 + $0x304] sm:$0xf] }
  0x3c   : > { %v2297_v33 = vor.u32 %v2464_v28, %v2294_v29  ;;  %v2455_v34 = vld [vmem:[%s2935_s11 + $0x33c] sm:$0xf0]  ;;  %v2222_v37 = vld [vmem:[%s2935_s11 + $0x340] sm:$0xf0]  ;;  %v2228_v38 = vld [vmem:[%s2935_s11 + $0x308] sm:$0xf] }
  0x3d   : > { %v2579_v8 = vpop.eup %2578  ;;  %1347 = vmatpush.bf16.msra.mxu3 %v2289_v26  ;;  %1365 = vmatpush.bf16.msrb.mxu1 %v2293_v27  ;;  %v2221_v36 = vor.u32 %v2455_v34, %v2220_v30  ;;  %v2456_v39 = vld [vmem:[%s2935_s11 + $0x344] sm:$0xf0]  ;;  %v2225_v41 = vor.u32 %v2447_v35, %v2222_v37  ;;  %v2448_v43 = vld [vmem:[%s2935_s11 + $0x30c] sm:$0xf]  ;;  %v2156_v45 = vld [vmem:[%s2935_s11 + $0x280] sm:$0xf] }
  0x3e   : > { %v418_v9 = vmul.f32 0.5, %v2579_v8  ;;  %vm422_vm3 = vweird.f32 %v2579_v8  ;;  %1383 = vmatpush.bf16.msrb.mxu0 %v2297_v33  ;;  %v2229_v42 = vor.u32 %v2456_v39, %v2228_v38  ;;  %v2230_v44 = vld [vmem:[%s2935_s11 + $0x348] sm:$0xf0]  ;;  %v2439_v48 = vld [vmem:[%s2935_s11 + $0x2bc] sm:$0xf0]  ;;  %vm436_vm4 = vcmask 80896  }
  0x3f   : > { %v2233_v47 = vor.u32 %v2448_v43, %v2230_v44  ;;  %v2431_v49 = vld [vmem:[%s2935_s11 + $0x284] sm:$0xf]  ;;  %1330 = vmatpush.bf16.msra.mxu2 %v2221_v36  ;;  %v2157_v54 = vor.u32 %v2439_v48, %v2156_v45  ;;  %v2164_v55 = vld [vmem:[%s2935_s11 + $0x288] sm:$0xf]  ;;  %v2432_v58 = vld [vmem:[%s2935_s11 + $0x28c] sm:$0xf] }
  0x40   : > { %397 = vperm.xlu0 %2574, %v387_v3   ;;  %v419_v10 = vsub.f32 1.0, %v418_v9  ;;  %v2158_v50 = vld [vmem:[%s2935_s11 + $0x2c0] sm:$0xf0]  ;;  %v2440_v57 = vld [vmem:[%s2935_s11 + $0x2c4] sm:$0xf0]  ;;  %s1825_s22 = sshll.u32 %s2758_s27, 4 }
  0x41   : > { %1348 = vmatpush.bf16.msra.mxu3 %v2225_v41  ;;  %1366 = vmatpush.bf16.msrb.mxu1 %v2229_v42  ;;  %v2161_v56 = vor.u32 %v2431_v49, %v2158_v50  ;;  %v2166_v59 = vld [vmem:[%s2935_s11 + $0x2c8] sm:$0xf0]  ;;  %v2165_v61 = vor.u32 %v2440_v57, %v2164_v55  ;;  %v2092_v63 = vld [vmem:[%s2935_s11 + $0x200] sm:$0xf]  ;;  %v2415_v1 = vld [vmem:[%s2935_s11 + $0x204] sm:$0xf] }
  0x42   : > { %1832 = vmatmul.msk.f32.gmra.mxu1 %vm476_vm2, %v387_v3  ;;  %v420_v11 = vmul.f32 %v2579_v8, %v419_v10  ;;  %1384 = vmatpush.bf16.msrb.mxu0 %v2233_v47  ;;  %v2169_v62 = vor.u32 %v2432_v58, %v2166_v59  ;;  %v2423_v0 = vld [vmem:[%s2935_s11 + $0x23c] sm:$0xf0]  ;;  %v2100_v3 = vld [vmem:[%s2935_s11 + $0x208] sm:$0xf]  ;;  %v2102_v9 = vld [vmem:[%s2935_s11 + $0x248] sm:$0xf0] }
  0x43   : > { %v2424_v4 = vld [vmem:[%s2935_s11 + $0x244] sm:$0xf0]  ;;  %1331 = vmatpush.bf16.msra.mxu2 %v2157_v54  ;;  %v2093_v7 = vor.u32 %v2423_v0, %v2092_v63  ;;  %v2407_v21 = vld [vmem:[%s2935_s11 + $0x1bc] sm:$0xf0]  ;;  %v2399_v22 = vld [vmem:[%s2935_s11 + $0x184] sm:$0xf] }
  0x44   : > { %v421_v13 = vadd.f32 %v2579_v8, %v420_v11  ;;  %v2030_v24 = vld [vmem:[%s2935_s11 + $0x1c0] sm:$0xf0]  ;;  %v2408_v26 = vld [vmem:[%s2935_s11 + $0x1c4] sm:$0xf0]  ;;  %v2400_v29 = vld [vmem:[%s2935_s11 + $0x18c] sm:$0xf] }
  0x45   : > { %1349 = vmatpush.bf16.msra.mxu3 %v2161_v56  ;;  %1367 = vmatpush.bf16.msrb.mxu1 %v2165_v61  ;;  %v2033_v27 = vor.u32 %v2399_v22, %v2030_v24  ;;  %v2038_v30 = vld [vmem:[%s2935_s11 + $0x1c8] sm:$0xf0]  ;;  %v2391_v33 = vld [vmem:[%s2935_s11 + $0x13c] sm:$0xf0]  ;;  %v2383_v34 = vld [vmem:[%s2935_s11 + $0x104] sm:$0xf] }
  0x46   : > { %v2962_v25 = vsel %vm422_vm3, %v2579_v8, %v421_v13  ;;  %v2416_v8 = vld [vmem:[%s2935_s11 + $0x20c] sm:$0xf]  ;;  %1385 = vmatpush.bf16.msrb.mxu0 %v2169_v62  ;;  %v1966_v36 = vld [vmem:[%s2935_s11 + $0x140] sm:$0xf0]  ;;  %v1972_v37 = vld [vmem:[%s2935_s11 + $0x108] sm:$0xf] }
  0x47   : > { %v2105_v13 = vor.u32 %v2416_v8, %v2102_v9  ;;  %1332 = vmatpush.bf16.msra.mxu2 %v2093_v7  ;;  %v2392_v38 = vld [vmem:[%s2935_s11 + $0x144] sm:$0xf0]  ;;  %v1969_v39 = vor.u32 %v2383_v34, %v1966_v36  ;;  %v2384_v41 = vld [vmem:[%s2935_s11 + $0x10c] sm:$0xf]  ;;  %v1900_v44 = vld [vmem:[%s2935_s11 + $0x80] sm:$0xf] }
  0x48   : > { %v1974_v42 = vld [vmem:[%s2935_s11 + $0x148] sm:$0xf0]  ;;  %v2375_v45 = vld [vmem:[%s2935_s11 + $0xbc] sm:$0xf0]  ;;  %v1902_v48 = vld [vmem:[%s2935_s11 + $0xc0] sm:$0xf0] }
  0x49   : > { %v1977_v43 = vor.u32 %v2384_v41, %v1974_v42  ;;  %v1901_v47 = vor.u32 %v2375_v45, %v1900_v44  ;;  %v1908_v49 = vld [vmem:[%s2935_s11 + $0x88] sm:$0xf]  ;;  %v1910_v54 = vld [vmem:[%s2935_s11 + $0xc8] sm:$0xf0]  ;;  %v1836_v56 = vld [vmem:[%s2935_s11] sm:$0xf] }
  0x4a   : > { %1833 = vmatmul.msk.f32.gmra.mxu1 %vm476_vm2, %v388_v2  ;;  %v2094_v2 = vld [vmem:[%s2935_s11 + $0x240] sm:$0xf0]  ;;  %1386 = vmatpush.bf16.msrb.mxu0 %v2105_v13  ;;  %v2376_v50 = vld [vmem:[%s2935_s11 + $0xc4] sm:$0xf0]  ;;  %v2359_v57 = vld [vmem:[%s2935_s11 + $0x3c] sm:$0xf0] }
  0x4b   : > { %v2097_v10 = vor.u32 %v2415_v1, %v2094_v2  ;;  %v2351_v58 = vld [vmem:[%s2935_s11 + $0x4] sm:$0xf]  ;;  %v1837_v59 = vor.u32 %v2359_v57, %v1836_v56  ;;  %v1844_v61 = vld [vmem:[%s2935_s11 + $0x8] sm:$0xf]  ;;  %v2352_v1 = vld [vmem:[%s2935_s11 + $0xc] sm:$0xf] }
  0x4c   : > { %v2360_v62 = vld [vmem:[%s2935_s11 + $0x44] sm:$0xf0]  ;;  %v1846_v2 = vld [vmem:[%s2935_s11 + $0x48] sm:$0xf0]  ;;  %v2302_v8 = vld [vmem:[%s2935_s11 + $0x3d0] sm:$0xf0] }
  0x4d   : > { %1350 = vmatpush.bf16.msra.mxu3 %v2097_v10  ;;  %v1845_v0 = vor.u32 %v2360_v62, %v1844_v61  ;;  %v2308_v9 = vld [vmem:[%s2935_s11 + $0x398] sm:$0xf]  ;;  %v2466_v13 = vld [vmem:[%s2935_s11 + $0x39c] sm:$0xf]  ;;  %v2425_v41 = vld [vmem:[%s2935_s11 + $0x24c] sm:$0xf0] }
  0x4e   : > { %v2474_v10 = vld [vmem:[%s2935_s11 + $0x3d4] sm:$0xf0]  ;;  %v2450_v24 = vld [vmem:[%s2935_s11 + $0x31c] sm:$0xf]  ;;  %v2417_v42 = vld [vmem:[%s2935_s11 + $0x214] sm:$0xf] }
  0x4f   : > { %v2244_v22 = vld [vmem:[%s2935_s11 + $0x318] sm:$0xf]  ;;  %v2401_v56 = vld [vmem:[%s2935_s11 + $0x194] sm:$0xf]  ;;  %p380_p3 = scmp.lt.s32.totalorder %s1825_s22, 31  ;;  %s2480_s14 = smul.u32 192, %s2932_s7 }
  0x50   : > { %v2442_v34 = vld [vmem:[%s2935_s11 + $0x2d4] sm:$0xf0]  ;;  %s2479_s24 = sshll.u32 %s2758_s27, 6  ;;  %s3365_s16 = sld [smem:[#allocation19_spill]] }
  0x51   : > { %1351 = vmatpush.bf16.msra.mxu3 %v2033_v27  ;;  %v2116_v45 = vld [vmem:[%s2935_s11 + $0x218] sm:$0xf]  ;;  %s3378_s22 = smov (!%p380_p3, %s1825_s22), 31  ;;  %s3269_s4 = scalar_lea.vmem [#allocation8], %s2480_s14 }
  0x52   : > { %s3265_s21 = scalar_lea.vmem %s3341_s6, %s3378_s22  ;;  %s1681_s30 = sshll.u32 %s3269_s4, 4  ;;  %s1682_s30 = int_to_ptr.vmem [resolvable:$true] %s1681_s30 }
  0x53   : > { %s1666_s27 = scalar_lea.sflag [#allocation4], %s2932_s7 }
  0x55   : > { %1352 = vmatpush.bf16.msra.mxu3 %v1969_v39  ;;  %v2108_v39 = vld [vmem:[%s2935_s11 + $0x210] sm:$0xf] }
  0x56   : > { %v2109_v44 = vor.u32 %v2425_v41, %v2108_v39  ;;  %s1680_s8 = scalar_lea.hbm %s3365_s16, %s2479_s24  ;;  %s2696_s18 = scalar_lea.hbm %s3365_s16, 384 }
  0x57   : > { %s1683_s17 = sshll.u32 %s1680_s8, 4  ;;  %s1684_s17 = int_to_ptr.hbm [resolvable:$true] %s1683_s17 }
  0x58   : > { %s2690_s20 = sshra.s32 %s1684_s17, 4  ;;  %s2691_s20 = int_to_ptr.hbm [resolvable:$true] %s2690_s20 }
  0x59   : > { %s2692_s10 = scalar_lea.hbm %s2691_s20, 192  ;;  %p2697_p12 = scmp.lt.s32.totalorder %s2691_s20, %s3365_s16 }
  0x5a   : > { %p2693_p6 = scmp.ne.s32.totalorder %s2691_s20, %s2692_s10  ;;  %p2698_p13 = scmp.lt.s32.totalorder %s2696_s18, %s2692_s10 }
  0x5c   : > { %p2694_p9 = pnand %p2693_p6, %p2871_p8  ;;  %p2699_p0 = por %p2698_p13, %p2697_p12 }
  0x5e   : > { %p2695_p11 = pneg %p2694_p9 }
  0x60   : > { %p2700_p2 = pnand %p2699_p0, %p2695_p11 }
  0xaa   : > { %v393_v14 = vpop.permute.xlu0 %392  ;;  %v403_v16 = vpop.permute.xlu1 %402 }
  0xab   : > { %v408_v15 = vsub.f32 %v393_v14, %v2576_v12  ;;  %v410_v32 = vsub.f32 %v403_v16, %v2576_v12 }
  0xad   : > { %v411_v20 = vmul.f32 %v408_v15, %v408_v15  ;;  %v413_v53 = vmul.f32 %v410_v32, %v410_v32  ;;  %v1964_v32 = vld [vmem:[%s2935_s11 + $0x100] sm:$0xf] }
  0xae   : > { %v1965_v35 = vor.u32 %v2391_v33, %v1964_v32  ;;  %v2174_v32 = vld [vmem:[%s2935_s11 + $0x2d0] sm:$0xf0]  ;;  %v2180_v33 = vld [vmem:[%s2935_s11 + $0x298] sm:$0xf] }
  0xaf   : > { %v414_v31 = vsub.f32 0.0, %v411_v20  ;;  %v416_v6 = vsub.f32 0.0, %v413_v53  ;;  %v2028_v20 = vld [vmem:[%s2935_s11 + $0x180] sm:$0xf]  ;;  %v2368_v53 = vld [vmem:[%s2935_s11 + $0x8c] sm:$0xf]  ;;  %v2181_v36 = vor.u32 %v2442_v34, %v2180_v33 }
  0xb0   : > { %v2029_v23 = vor.u32 %v2407_v21, %v2028_v20  ;;  %v1913_v55 = vor.u32 %v2368_v53, %v1910_v54  ;;  %v2044_v54 = vld [vmem:[%s2935_s11 + $0x190] sm:$0xf]  ;;  %v2353_v34 = vld [vmem:[%s2935_s11 + $0x14] sm:$0xf] }
  0xb1   : > { %v424_v40 = vmul.f32 %v2962_v25, %v414_v31  ;;  %v426_v16 = vmul.f32 %v2962_v25, %v416_v6  ;;  %v2041_v31 = vor.u32 %v2400_v29, %v2038_v30  ;;  %v2465_v6 = vld [vmem:[%s2935_s11 + $0x394] sm:$0xf]  ;;  %v2441_v29 = vld [vmem:[%s2935_s11 + $0x2cc] sm:$0xf0] }
  0xb2   : > { %v398_v46 = vpop.permute.xlu0 %397  ;;  %1333 = vmatpush.bf16.msra.mxu2 %v2029_v23  ;;  %v2458_v23 = vld [vmem:[%s2935_s11 + $0x354] sm:$0xf0]  ;;  %v2433_v30 = vld [vmem:[%s2935_s11 + $0x294] sm:$0xf] }
  0xb3   : > { %v427_v51 = vmul.f32 1.442695, %v424_v40  ;;  %v409_v52 = vsub.f32 %v398_v46, %v2576_v12  ;;  %v2101_v12 = vor.u32 %v2424_v4, %v2100_v3  ;;  %v431_v17 = vmul.f32 1.442695, %v426_v16  ;;  %1387 = vmatpush.bf16.msrb.mxu0 %v2041_v31  ;;  %v2367_v46 = vld [vmem:[%s2935_s11 + $0x84] sm:$0xf] }
  0xb4   : > { %v1973_v40 = vor.u32 %v2392_v38, %v1972_v37  ;;  %v1849_v3 = vor.u32 %v2352_v1, %v1846_v2  ;;  %v2300_v4 = vld [vmem:[%s2935_s11 + $0x390] sm:$0xf]  ;;  %v2434_v37 = vld [vmem:[%s2935_s11 + $0x29c] sm:$0xf] }
  0xb5   : > { %2580 = vpow2.f32 %v427_v51  ;;  %v412_v60 = vmul.f32 %v409_v52, %v409_v52  ;;  %1368 = vmatpush.bf16.msrb.mxu1 %v2101_v12  ;;  %v1905_v51 = vor.u32 %v2367_v46, %v1902_v48  ;;  %v1909_v52 = vor.u32 %v2376_v50, %v1908_v49  ;;  %v2182_v38 = vld [vmem:[%s2935_s11 + $0x2d8] sm:$0xf0]  ;;  %v2426_v46 = vld [vmem:[%s2935_s11 + $0x254] sm:$0xf0]  ;;  %v1980_v1 = vld [vmem:[%s2935_s11 + $0x110] sm:$0xf] }
  0xb6   : > { %1334 = vmatpush.bf16.msra.mxu2 %v1965_v35  ;;  %v2309_v12 = vor.u32 %v2474_v10, %v2308_v9  ;;  %v2177_v35 = vor.u32 %v2433_v30, %v2174_v32  ;;  %v2117_v50 = vor.u32 %v2426_v46, %v2116_v45  ;;  %v2394_v9 = vld [vmem:[%s2935_s11 + $0x154] sm:$0xf0]  ;;  %v2386_v10 = vld [vmem:[%s2935_s11 + $0x11c] sm:$0xf]  ;;  %v2361_v30 = vld [vmem:[%s2935_s11 + $0x4c] sm:$0xf0] }
  0xb7   : > { %v415_v5 = vsub.f32 0.0, %v412_v60  ;;  %1388 = vmatpush.bf16.msrb.mxu0 %v1977_v43  ;;  %1353 = vmatpush.bf16.msra.mxu3 %v1905_v51  ;;  %v1838_v60 = vld [vmem:[%s2935_s11 + $0x40] sm:$0xf0]  ;;  %v2110_v43 = vld [vmem:[%s2935_s11 + $0x250] sm:$0xf0]  ;;  %v504_v48 = vpop.f32.mrf.mxu1 }
  0xb8   : > { %v1841_v63 = vor.u32 %v2351_v58, %v1838_v60  ;;  %v2113_v49 = vor.u32 %v2417_v42, %v2110_v43  ;;  %v2118_v51 = vld [vmem:[%s2935_s11 + $0x258] sm:$0xf0]  ;;  %v2046_v58 = vld [vmem:[%s2935_s11 + $0x1d0] sm:$0xf0]  ;;  %v2410_v60 = vld [vmem:[%s2935_s11 + $0x1d4] sm:$0xf0] }
  0xb9   : > { %v425_v11 = vmul.f32 %v2962_v25, %v415_v5  ;;  %v2036_v25 = vld [vmem:[%s2935_s11 + $0x188] sm:$0xf]  ;;  %v2473_v5 = vld [vmem:[%s2935_s11 + $0x3cc] sm:$0xf0]  ;;  %v2049_v61 = vor.u32 %v2401_v56, %v2046_v58  ;;  %v2354_v42 = vld [vmem:[%s2935_s11 + $0x1c] sm:$0xf] }
  0xba   : > { %v2037_v28 = vor.u32 %v2408_v26, %v2036_v25  ;;  %1335 = vmatpush.bf16.msra.mxu2 %v1901_v47  ;;  %v2301_v7 = vor.u32 %v2473_v5, %v2300_v4  ;;  %v2245_v25 = vor.u32 %v2458_v23, %v2244_v22  ;;  %v2246_v26 = vld [vmem:[%s2935_s11 + $0x358] sm:$0xf0]  ;;  %v2385_v4 = vld [vmem:[%s2935_s11 + $0x114] sm:$0xf]  ;;  %v1924_v22 = vld [vmem:[%s2935_s11 + $0x98] sm:$0xf] }
  0xbb   : > { %v2581_v14 = vpop.eup %2580  ;;  %v429_v15 = vmul.f32 1.442695, %v425_v11  ;;  %1389 = vmatpush.bf16.msrb.mxu0 %v1913_v55  ;;  %1354 = vmatpush.bf16.msra.mxu3 %v1841_v63  ;;  %v2305_v11 = vor.u32 %v2465_v6, %v2302_v8  ;;  %v2249_v27 = vor.u32 %v2450_v24, %v2246_v26  ;;  %v2418_v47 = vld [vmem:[%s2935_s11 + $0x21c] sm:$0xf]  ;;  %v2409_v55 = vld [vmem:[%s2935_s11 + $0x1cc] sm:$0xf0] }
  0xbc   : > { %1827 = vmatmul.msk.f32.vlgmr.msra.gmra.mxu0 %vm436_vm4, %v2581_v14  ;;  %1369 = vmatpush.bf16.msrb.mxu1 %v2037_v28  ;;  %v2310_v14 = vld [vmem:[%s2935_s11 + $0x3d8] sm:$0xf0]  ;;  %v2172_v28 = vld [vmem:[%s2935_s11 + $0x290] sm:$0xf]  ;;  %v2045_v57 = vor.u32 %v2409_v55, %v2044_v54  ;;  %v1982_v5 = vld [vmem:[%s2935_s11 + $0x150] sm:$0xf0] }
  0xbd   : > { %2582 = vpow2.f32 %v429_v15  ;;  %v2236_v15 = vld [vmem:[%s2935_s11 + $0x310] sm:$0xf]  ;;  %v2313_v16 = vor.u32 %v2466_v13, %v2310_v14  ;;  %v2173_v31 = vor.u32 %v2441_v29, %v2172_v28  ;;  %v2402_v63 = vld [vmem:[%s2935_s11 + $0x19c] sm:$0xf]  ;;  %v1988_v8 = vld [vmem:[%s2935_s11 + $0x118] sm:$0xf] }
  0xbe   : > { %2584 = vpow2.f32 %v431_v17  ;;  %1336 = vmatpush.bf16.msra.mxu2 %v1837_v59  ;;  %v2457_v17 = vld [vmem:[%s2935_s11 + $0x34c] sm:$0xf0]  ;;  %v2052_v59 = vld [vmem:[%s2935_s11 + $0x198] sm:$0xf]  ;;  %v1989_v13 = vor.u32 %v2394_v9, %v1988_v8  ;;  %v1990_v14 = vld [vmem:[%s2935_s11 + $0x158] sm:$0xf0] }
  0xbf   : > { %1390 = vmatpush.bf16.msrb.mxu0 %v1849_v3  ;;  %1419 = vmatpush.bf16.msrb.mxu3 %v2305_v11  ;;  %v2237_v20 = vor.u32 %v2457_v17, %v2236_v15  ;;  %v2053_v62 = vor.u32 %v2410_v60, %v2052_v59  ;;  %v2393_v3 = vld [vmem:[%s2935_s11 + $0x14c] sm:$0xf0]  ;;  %v1993_v17 = vor.u32 %v2386_v10, %v1990_v14  ;;  %v2378_v23 = vld [vmem:[%s2935_s11 + $0xd4] sm:$0xf0]  ;;  %v2370_v24 = vld [vmem:[%s2935_s11 + $0x9c] sm:$0xf] }
  0xc0   : > { %1370 = vmatpush.bf16.msrb.mxu1 %v1973_v40  ;;  %v2185_v40 = vor.u32 %v2434_v37, %v2182_v38  ;;  %v1981_v6 = vor.u32 %v2393_v3, %v1980_v1  ;;  %v1916_v15 = vld [vmem:[%s2935_s11 + $0x90] sm:$0xf]  ;;  %v1926_v28 = vld [vmem:[%s2935_s11 + $0xd8] sm:$0xf0]  ;;  %v2362_v37 = vld [vmem:[%s2935_s11 + $0x54] sm:$0xf0] }
  0xc1   : > { %v1852_v29 = vld [vmem:[%s2935_s11 + $0x10] sm:$0xf]  ;;  %v1929_v33 = vor.u32 %v2370_v24, %v1926_v28  ;;  %v1862_v43 = vld [vmem:[%s2935_s11 + $0x58] sm:$0xf0]  ;;  %v2318_v55 = vld [vmem:[%s2935_s11 + $0x3e0] sm:$0xf0] }
  0xc2   : > { %1401 = vmatpush.bf16.msrb.mxu2 %v2301_v7  ;;  %v1985_v7 = vor.u32 %v2385_v4, %v1982_v5  ;;  %v1853_v39 = vor.u32 %v2361_v30, %v1852_v29  ;;  %v2324_v56 = vld [vmem:[%s2935_s11 + $0x3a8] sm:$0xf]  ;;  %v2468_v60 = vld [vmem:[%s2935_s11 + $0x3ac] sm:$0xf]  ;;  %v2459_v1 = vld [vmem:[%s2935_s11 + $0x35c] sm:$0xf0] }
  0xc3   : > { %v2583_v18 = vpop.eup %2582  ;;  %1455 = vmatpush.bf16.msra.mxu0 %v2313_v16  ;;  %v507_v16 = vpop.f32.mrf.mxu1  ;;  %v2254_v3 = vld [vmem:[%s2935_s11 + $0x360] sm:$0xf0]  ;;  %v2452_v8 = vld [vmem:[%s2935_s11 + $0x32c] sm:$0xf]  ;;  %v2443_v14 = vld [vmem:[%s2935_s11 + $0x2dc] sm:$0xf0] }
  0xc4   : > { %1828 = vmatmul.msk.f32.gmra.mxu0 %vm436_vm4, %v2583_v18  ;;  %v2585_v19 = vpop.eup %2584  ;;  %1371 = vmatpush.bf16.msrb.mxu1 %v1909_v52  ;;  %v2449_v18 = vld [vmem:[%s2935_s11 + $0x314] sm:$0xf]  ;;  %v2121_v52 = vor.u32 %v2418_v47, %v2118_v51  ;;  %v2475_v51 = vld [vmem:[%s2935_s11 + $0x3dc] sm:$0xf0]  ;;  %v2126_v28 = vld [vmem:[%s2935_s11 + $0x260] sm:$0xf0] }
  0xc5   : > { %v2124_v24 = vld [vmem:[%s2935_s11 + $0x220] sm:$0xf]  ;;  %v2132_v29 = vld [vmem:[%s2935_s11 + $0x228] sm:$0xf] }
  0xc6   : > { %1402 = vmatpush.bf16.msrb.mxu2 %v2237_v20  ;;  %v1918_v20 = vld [vmem:[%s2935_s11 + $0xd0] sm:$0xf0]  ;;  %v2428_v30 = vld [vmem:[%s2935_s11 + $0x264] sm:$0xf0] }
  0xc7   : > { %1456 = vmatpush.bf16.msra.mxu0 %v2249_v27  ;;  %v1925_v27 = vor.u32 %v2378_v23, %v1924_v22  ;;  %v2198_v23 = vld [vmem:[%s2935_s11 + $0x2e8] sm:$0xf0] }
  0xc8   : > { %1372 = vmatpush.bf16.msrb.mxu1 %v1845_v0  ;;  %v2054_v0 = vld [vmem:[%s2935_s11 + $0x1d8] sm:$0xf0] }
  0xc9   : > { %v2057_v2 = vor.u32 %v2402_v63, %v2054_v0 }
  0xca   : > { %1403 = vmatpush.bf16.msrb.mxu2 %v2173_v31 }
  0xcb   : > { %1457 = vmatpush.bf16.msra.mxu0 %v2185_v40  ;;  %v510_v46 = vpop.f32.mrf.mxu1 }
  0xcc   : > { %1829 = vmatmul.msk.f32.gmra.mxu0 %vm436_vm4, %v2585_v19  ;;  %v2238_v19 = vld [vmem:[%s2935_s11 + $0x350] sm:$0xf0]  ;;  %1437 = vmatpush.bf16.msra.mxu1 %v2309_v12  ;;  %v3075_v12 = vld [vmem:[#allocation5] ss:$0 sm:$0xff] }
  0xcd   : > { %v2241_v21 = vor.u32 %v2449_v18, %v2238_v19  ;;  %v2377_v18 = vld [vmem:[%s2935_s11 + $0xcc] sm:$0xf0]  ;;  %v2369_v19 = vld [vmem:[%s2935_s11 + $0x94] sm:$0xf] }
  0xce   : > { %1404 = vmatpush.bf16.msrb.mxu2 %v2109_v44  ;;  %v1921_v26 = vor.u32 %v2369_v19, %v1918_v20  ;;  %v2444_v19 = vld [vmem:[%s2935_s11 + $0x2e4] sm:$0xf0]  ;;  %v2436_v20 = vld [vmem:[%s2935_s11 + $0x2ac] sm:$0xf] }
  0xcf   : > { %1420 = vmatpush.bf16.msrb.mxu3 %v2241_v21  ;;  %1458 = vmatpush.bf16.msra.mxu0 %v2121_v52  ;;  %v1917_v21 = vor.u32 %v2377_v18, %v1916_v15  ;;  %v2467_v52 = vld [vmem:[%s2935_s11 + $0x3a4] sm:$0xf]  ;;  %v2196_v18 = vld [vmem:[%s2935_s11 + $0x2a8] sm:$0xf] }
  0xd0   : > { %1438 = vmatpush.bf16.msra.mxu1 %v2245_v25  ;;  %v2321_v58 = vor.u32 %v2467_v52, %v2318_v55  ;;  %v2435_v15 = vld [vmem:[%s2935_s11 + $0x2a4] sm:$0xf]  ;;  %v2197_v22 = vor.u32 %v2444_v19, %v2196_v18  ;;  %v2395_v52 = vld [vmem:[%s2935_s11 + $0x15c] sm:$0xf0] }
  0xd2   : > { %1405 = vmatpush.bf16.msrb.mxu2 %v2045_v57  ;;  %v2476_v57 = vld [vmem:[%s2935_s11 + $0x3e4] sm:$0xf0] }
  0xd3   : > { %1421 = vmatpush.bf16.msrb.mxu3 %v2177_v35  ;;  %1459 = vmatpush.bf16.msra.mxu0 %v2057_v2  ;;  %v1854_v35 = vld [vmem:[%s2935_s11 + $0x50] sm:$0xf0]  ;;  %v2325_v59 = vor.u32 %v2476_v57, %v2324_v56  ;;  %v2451_v2 = vld [vmem:[%s2935_s11 + $0x324] sm:$0xf]  ;;  %v2004_v57 = vld [vmem:[%s2935_s11 + $0x128] sm:$0xf] }
  0xd4   : > { %1439 = vmatpush.bf16.msra.mxu1 %v2181_v36  ;;  %v1860_v36 = vld [vmem:[%s2935_s11 + $0x18] sm:$0xf]  ;;  %v1857_v40 = vor.u32 %v2353_v34, %v1854_v35  ;;  %v2257_v5 = vor.u32 %v2451_v2, %v2254_v3  ;;  %v2420_v34 = vld [vmem:[%s2935_s11 + $0x22c] sm:$0xf]  ;;  %v1940_v2 = vld [vmem:[%s2935_s11 + $0xa8] sm:$0xf] }
  0xd5   : > { %v1861_v41 = vor.u32 %v2362_v37, %v1860_v36  ;;  %v2134_v35 = vld [vmem:[%s2935_s11 + $0x268] sm:$0xf0] }
  0xd6   : > { %1406 = vmatpush.bf16.msrb.mxu2 %v1981_v6  ;;  %v2260_v6 = vld [vmem:[%s2935_s11 + $0x328] sm:$0xf]  ;;  %v2137_v37 = vor.u32 %v2420_v34, %v2134_v35  ;;  %v2268_v34 = vld [vmem:[%s2935_s11 + $0x330] sm:$0xf] }
  0xd7   : > { %1422 = vmatpush.bf16.msrb.mxu3 %v2113_v49  ;;  %1460 = vmatpush.bf16.msra.mxu0 %v1993_v17 }
  0xd8   : > { %1440 = vmatpush.bf16.msra.mxu1 %v2117_v50  ;;  %v2316_v50 = vld [vmem:[%s2935_s11 + $0x3a0] sm:$0xf] }
  0xd9   : > { %v2317_v54 = vor.u32 %v2475_v51, %v2316_v50  ;;  %v1996_v50 = vld [vmem:[%s2935_s11 + $0x120] sm:$0xf] }
  0xda   : > { %1407 = vmatpush.bf16.msrb.mxu2 %v1917_v21  ;;  %v1997_v55 = vor.u32 %v2395_v52, %v1996_v50  ;;  %v2206_v52 = vld [vmem:[%s2935_s11 + $0x2f0] sm:$0xf0] }
  0xdb   : > { %1423 = vmatpush.bf16.msrb.mxu3 %v2049_v61  ;;  %1461 = vmatpush.bf16.msra.mxu0 %v1929_v33  ;;  %v2326_v61 = vld [vmem:[%s2935_s11 + $0x3e8] sm:$0xf0]  ;;  %v2133_v33 = vor.u32 %v2428_v30, %v2132_v29  ;;  %v2478_v29 = vld [vmem:[%s2935_s11 + $0x3f4] sm:$0xf0] }
  0xdc   : > { %1441 = vmatpush.bf16.msra.mxu1 %v2053_v62  ;;  %v2252_v62 = vld [vmem:[%s2935_s11 + $0x320] sm:$0xf]  ;;  %v2329_v0 = vor.u32 %v2468_v60, %v2326_v61  ;;  %v2006_v61 = vld [vmem:[%s2935_s11 + $0x168] sm:$0xf0] }
  0xdd   : > { %v2253_v4 = vor.u32 %v2459_v1, %v2252_v62  ;;  %v1932_v62 = vld [vmem:[%s2935_s11 + $0xa0] sm:$0xf]  ;;  %v1934_v1 = vld [vmem:[%s2935_s11 + $0xe0] sm:$0xf0] }
  0xde   : > { %1408 = vmatpush.bf16.msrb.mxu2 %v1853_v39  ;;  %v2411_v39 = vld [vmem:[%s2935_s11 + $0x1dc] sm:$0xf0] }
  0xdf   : > { %1424 = vmatpush.bf16.msrb.mxu3 %v1985_v7  ;;  %v2460_v7 = vld [vmem:[%s2935_s11 + $0x364] sm:$0xf0] }
  0xe0   : > { %1442 = vmatpush.bf16.msra.mxu1 %v1989_v13  ;;  %v2261_v10 = vor.u32 %v2460_v7, %v2260_v6  ;;  %v2372_v6 = vld [vmem:[%s2935_s11 + $0xac] sm:$0xf] }
  0xe1   : > { %v1942_v7 = vld [vmem:[%s2935_s11 + $0xe8] sm:$0xf0] }
  0xe3   : > { %1425 = vmatpush.bf16.msrb.mxu3 %v1921_v26  ;;  %v2201_v26 = vor.u32 %v2436_v20, %v2198_v23  ;;  %v2356_v20 = vld [vmem:[%s2935_s11 + $0x2c] sm:$0xf]  ;;  %v2332_v23 = vld [vmem:[%s2935_s11 + $0x3b0] sm:$0xf] }
  0xe4   : > { %1443 = vmatpush.bf16.msra.mxu1 %v1925_v27  ;;  %v2419_v27 = vld [vmem:[%s2935_s11 + $0x224] sm:$0xf] }
  0xe7   : > { %1426 = vmatpush.bf16.msrb.mxu3 %v1857_v40  ;;  %v2403_v40 = vld [vmem:[%s2935_s11 + $0x1a4] sm:$0xf] }
  0xe8   : > { %1444 = vmatpush.bf16.msra.mxu1 %v1861_v41 }
 0x139   : > { %v467_v53 = vpop.f32.mrf.mxu0 }
 0x13a   : > { %v505_v11 = vadd.f32 %v504_v48, %v467_v53  ;;  %v1865_v48 = vor.u32 %v2354_v42, %v1862_v43  ;;  %v2062_v42 = vld [vmem:[%s2935_s11 + $0x1e0] sm:$0xf0]  ;;  %v2068_v43 = vld [vmem:[%s2935_s11 + $0x1a8] sm:$0xf] }
 0x13c   : > { %v517_v31 = vadd.f32 %v3075_v12, %v505_v11  ;;  %1462 = vmatpush.bf16.msra.mxu0 %v1865_v48  ;;  %v2262_v11 = vld [vmem:[%s2935_s11 + $0x368] sm:$0xf0] }
 0x13d   : > { %v2265_v13 = vor.u32 %v2452_v8, %v2262_v11  ;;  %v2404_v48 = vld [vmem:[%s2935_s11 + $0x1ac] sm:$0xf]  ;;  %v2363_v11 = vld [vmem:[%s2935_s11 + $0x5c] sm:$0xf0] }
 0x13e   : > { %v520_v44 = vmax.f32 %v517_v31, 0.0 }
 0x141   : > { %v470_v25 = vpop.f32.mrf.mxu0 }
 0x142   : > { %v508_v32 = vadd.f32 %v507_v16, %v470_v25  ;;  %v2190_v16 = vld [vmem:[%s2935_s11 + $0x2e0] sm:$0xf0]  ;;  %v2427_v25 = vld [vmem:[%s2935_s11 + $0x25c] sm:$0xf0] }
 0x143   : > { %v2193_v21 = vor.u32 %v2435_v15, %v2190_v16  ;;  %v2125_v31 = vor.u32 %v2427_v25, %v2124_v24  ;;  %v2364_v15 = vld [vmem:[%s2935_s11 + $0x64] sm:$0xf0]  ;;  %v1945_v16 = vor.u32 %v2372_v6, %v1942_v7  ;;  %v2477_v24 = vld [vmem:[%s2935_s11 + $0x3ec] sm:$0xf0]  ;;  %v2469_v25 = vld [vmem:[%s2935_s11 + $0x3b4] sm:$0xf] }
 0x144   : > { %v518_v38 = vadd.f32 %v3075_v12, %v508_v32  ;;  %v2129_v32 = vor.u32 %v2419_v27, %v2126_v28  ;;  %v2334_v27 = vld [vmem:[%s2935_s11 + $0x3f0] sm:$0xf0]  ;;  %v2340_v28 = vld [vmem:[%s2935_s11 + $0x3b8] sm:$0xf]  ;;  %v2422_v6 = vld [vmem:[%s2935_s11 + $0x23c] sm:$0xf] }
 0x145   : > { %v2337_v30 = vor.u32 %v2469_v25, %v2334_v27  ;;  %v2150_v7 = vld [vmem:[%s2935_s11 + $0x278] sm:$0xf0]  ;;  %v2020_v27 = vld [vmem:[%s2935_s11 + $0x138] sm:$0xf] }
 0x146   : > { %v521_v45 = vmax.f32 %v518_v38, 0.0  ;;  %v2060_v38 = vld [vmem:[%s2935_s11 + $0x1a0] sm:$0xf] }
 0x147   : > { %v2061_v41 = vor.u32 %v2411_v39, %v2060_v38  ;;  %v2453_v38 = vld [vmem:[%s2935_s11 + $0x334] sm:$0xf] }
 0x148   : > { %v3096_v47 = vpack.c.bf16 %v521_v45, %v520_v44  ;;  %v2412_v44 = vld [vmem:[%s2935_s11 + $0x1e4] sm:$0xf0]  ;;  %v2065_v45 = vor.u32 %v2403_v40, %v2062_v42  ;;  %v2270_v39 = vld [vmem:[%s2935_s11 + $0x370] sm:$0xf0]  ;;  %v2276_v42 = vld [vmem:[%s2935_s11 + $0x338] sm:$0xf] }
 0x149   : > { %v473_v49 = vpop.f32.mrf.mxu0 }
 0x14a   : > { %1337 = vmatmul.bf16.vlgmr.msra.gmra.mxu2 %v3096_v47  ;;  %1355 = vmatmul.bf16.vlgmr.msra.gmra.mxu3 %v3096_v47  ;;  %v511_v53 = vadd.f32 %v510_v46, %v473_v49  ;;  %v2069_v46 = vor.u32 %v2412_v44, %v2068_v43  ;;  %v2070_v49 = vld [vmem:[%s2935_s11 + $0x1e8] sm:$0xf0]  ;;  %v2462_v43 = vld [vmem:[%s2935_s11 + $0x374] sm:$0xf0]  ;;  %v2454_v44 = vld [vmem:[%s2935_s11 + $0x33c] sm:$0xf] }
 0x14b   : > { %1373 = vmatmul.bf16.vlgmr.msrb.gmra.mxu1 %v3096_v47  ;;  %1391 = vmatmul.bf16.vlgmr.msrb.gmra.mxu0 %v3096_v47  ;;  %v2073_v51 = vor.u32 %v2404_v48, %v2070_v49  ;;  %v2204_v48 = vld [vmem:[%s2935_s11 + $0x2b0] sm:$0xf] }
 0x14c   : > { %v519_v63 = vadd.f32 %v3075_v12, %v511_v53  ;;  %1473 = vmatpush.bf16.msra.mxu2 %v2317_v54  ;;  %1491 = vmatpush.bf16.msra.mxu3 %v2321_v58  ;;  %v2188_v12 = vld [vmem:[%s2935_s11 + $0x2a0] sm:$0xf]  ;;  %v2387_v53 = vld [vmem:[%s2935_s11 + $0x124] sm:$0xf]  ;;  %v2396_v58 = vld [vmem:[%s2935_s11 + $0x164] sm:$0xf0] }
 0x14d   : > { %1509 = vmatpush.bf16.msrb.mxu1 %v2325_v59  ;;  %1527 = vmatpush.bf16.msrb.mxu0 %v2329_v0  ;;  %v2189_v17 = vor.u32 %v2443_v14, %v2188_v12  ;;  %v1998_v54 = vld [vmem:[%s2935_s11 + $0x160] sm:$0xf0]  ;;  %v2388_v59 = vld [vmem:[%s2935_s11 + $0x12c] sm:$0xf]  ;;  %v2005_v60 = vor.u32 %v2396_v58, %v2004_v57  ;;  %v1876_v14 = vld [vmem:[%s2935_s11 + $0x28] sm:$0xf] }
 0x14e   : > { %v522_v9 = vmax.f32 %v519_v63, 0.0  ;;  %v2001_v56 = vor.u32 %v2387_v53, %v1998_v54  ;;  %v2379_v63 = vld [vmem:[%s2935_s11 + $0xdc] sm:$0xf0]  ;;  %v2371_v0 = vld [vmem:[%s2935_s11 + $0xa4] sm:$0xf]  ;;  %v2009_v3 = vor.u32 %v2388_v59, %v2006_v61  ;;  %v1877_v19 = vor.u32 %v2364_v15, %v1876_v14 }
 0x14f   : > { %v1937_v8 = vor.u32 %v2371_v0, %v1934_v1  ;;  %v2355_v12 = vld [vmem:[%s2935_s11 + $0x24] sm:$0xf]  ;;  %v2445_v49 = vld [vmem:[%s2935_s11 + $0x2ec] sm:$0xf0]  ;;  %v2212_v53 = vld [vmem:[%s2935_s11 + $0x2b8] sm:$0xf] }
 0x150   : > { %1474 = vmatpush.bf16.msra.mxu2 %v2253_v4  ;;  %1492 = vmatpush.bf16.msra.mxu3 %v2257_v5  ;;  %v3135_v36 = vpack.c.bf16 %v522_v9, %v522_v9  ;;  %v1933_v4 = vor.u32 %v2379_v63, %v1932_v62  ;;  %v2380_v5 = vld [vmem:[%s2935_s11 + $0xe4] sm:$0xf0]  ;;  %v2205_v54 = vor.u32 %v2445_v49, %v2204_v48  ;;  %v2214_v57 = vld [vmem:[%s2935_s11 + $0x2f8] sm:$0xf0]  ;;  %v2429_v61 = vld [vmem:[%s2935_s11 + $0x26c] sm:$0xf0] }
 0x151   : > { %1510 = vmatpush.bf16.msrb.mxu1 %v2261_v10  ;;  %1528 = vmatpush.bf16.msrb.mxu0 %v2265_v13  ;;  %v1941_v9 = vor.u32 %v2380_v5, %v1940_v2  ;;  %v1868_v10 = vld [vmem:[%s2935_s11 + $0x20] sm:$0xf]  ;;  %v1870_v13 = vld [vmem:[%s2935_s11 + $0x60] sm:$0xf0]  ;;  %v2421_v62 = vld [vmem:[%s2935_s11 + $0x234] sm:$0xf] }
 0x152   : > { %v1873_v18 = vor.u32 %v2355_v12, %v1870_v13  ;;  %v2142_v0 = vld [vmem:[%s2935_s11 + $0x270] sm:$0xf0]  ;;  %v2148_v1 = vld [vmem:[%s2935_s11 + $0x238] sm:$0xf] }
 0x153   : > { %v2430_v2 = vld [vmem:[%s2935_s11 + $0x274] sm:$0xf0]  ;;  %v2078_v13 = vld [vmem:[%s2935_s11 + $0x1f0] sm:$0xf0] }
 0x154   : > { %1475 = vmatpush.bf16.msra.mxu2 %v2189_v17  ;;  %1493 = vmatpush.bf16.msra.mxu3 %v2193_v21  ;;  %v1869_v17 = vor.u32 %v2363_v11, %v1868_v10  ;;  %v1878_v21 = vld [vmem:[%s2935_s11 + $0x68] sm:$0xf0]  ;;  %v2149_v5 = vor.u32 %v2430_v2, %v2148_v1  ;;  %v2413_v10 = vld [vmem:[%s2935_s11 + $0x1ec] sm:$0xf0]  ;;  %v2405_v11 = vld [vmem:[%s2935_s11 + $0x1b4] sm:$0xf] }
 0x155   : > { %1511 = vmatpush.bf16.msrb.mxu1 %v2197_v22  ;;  %1529 = vmatpush.bf16.msrb.mxu0 %v2201_v26  ;;  %v1881_v22 = vor.u32 %v2356_v20, %v1878_v21  ;;  %v2333_v26 = vor.u32 %v2477_v24, %v2332_v23  ;;  %v2084_v14 = vld [vmem:[%s2935_s11 + $0x1b8] sm:$0xf]  ;;  %v2012_v20 = vld [vmem:[%s2935_s11 + $0x130] sm:$0xf]  ;;  %v2389_v23 = vld [vmem:[%s2935_s11 + $0x134] sm:$0xf] }
 0x156   : > { %v2414_v15 = vld [vmem:[%s2935_s11 + $0x1f4] sm:$0xf0]  ;;  %v2014_v24 = vld [vmem:[%s2935_s11 + $0x170] sm:$0xf0] }
 0x157   : > { %v2357_v48 = vld [vmem:[%s2935_s11 + $0x34] sm:$0xf] }
 0x158   : > { %1476 = vmatpush.bf16.msra.mxu2 %v2125_v31  ;;  %1494 = vmatpush.bf16.msra.mxu3 %v2129_v32  ;;  %v2341_v31 = vor.u32 %v2478_v29, %v2340_v28  ;;  %v2470_v32 = vld [vmem:[%s2935_s11 + $0x3bc] sm:$0xf]  ;;  %v2398_v28 = vld [vmem:[%s2935_s11 + $0x174] sm:$0xf0]  ;;  %v1886_v49 = vld [vmem:[%s2935_s11 + $0x70] sm:$0xf0] }
 0x159   : > { %1512 = vmatpush.bf16.msrb.mxu1 %v2133_v33  ;;  %1530 = vmatpush.bf16.msrb.mxu0 %v2137_v37  ;;  %v2342_v33 = vld [vmem:[%s2935_s11 + $0x3f8] sm:$0xf0]  ;;  %v2461_v37 = vld [vmem:[%s2935_s11 + $0x36c] sm:$0xf0] }
 0x15a   : > { %1342 = vmatmul.bf16.gmra.mxu2 %v3135_v36  ;;  %1360 = vmatmul.bf16.gmra.mxu3 %v3135_v36  ;;  %v2345_v35 = vor.u32 %v2470_v32, %v2342_v33  ;;  %v2269_v40 = vor.u32 %v2461_v37, %v2268_v34  ;;  %v2390_v29 = vld [vmem:[%s2935_s11 + $0x13c] sm:$0xf]  ;;  %v1948_v32 = vld [vmem:[%s2935_s11 + $0xb0] sm:$0xf]  ;;  %v2373_v34 = vld [vmem:[%s2935_s11 + $0xb4] sm:$0xf] }
 0x15b   : > { %1378 = vmatmul.bf16.gmra.mxu1 %v3135_v36  ;;  %1396 = vmatmul.bf16.gmra.mxu0 %v3135_v36  ;;  %v2381_v33 = vld [vmem:[%s2935_s11 + $0xec] sm:$0xf0]  ;;  %v1956_v37 = vld [vmem:[%s2935_s11 + $0xb8] sm:$0xf] }
 0x15c   : > { %1477 = vmatpush.bf16.msra.mxu2 %v2061_v41  ;;  %1495 = vmatpush.bf16.msra.mxu3 %v2065_v45  ;;  %v2273_v41 = vor.u32 %v2453_v38, %v2270_v39  ;;  %v2277_v45 = vor.u32 %v2462_v43, %v2276_v42  ;;  %v1949_v39 = vor.u32 %v2381_v33, %v1948_v32  ;;  %v1958_v42 = vld [vmem:[%s2935_s11 + $0xf8] sm:$0xf0] }
 0x15d   : > { %1513 = vmatpush.bf16.msrb.mxu1 %v2069_v46  ;;  %1531 = vmatpush.bf16.msrb.mxu0 %v2073_v51  ;;  %v2278_v46 = vld [vmem:[%s2935_s11 + $0x378] sm:$0xf0]  ;;  %v2437_v51 = vld [vmem:[%s2935_s11 + $0x2b4] sm:$0xf] }
 0x15e   : > { %v2281_v50 = vor.u32 %v2454_v44, %v2278_v46  ;;  %v2209_v58 = vor.u32 %v2437_v51, %v2206_v52  ;;  %v2365_v46 = vld [vmem:[%s2935_s11 + $0x6c] sm:$0xf0]  ;;  %v2366_v51 = vld [vmem:[%s2935_s11 + $0x74] sm:$0xf0] }
 0x160   : > { %1478 = vmatpush.bf16.msra.mxu2 %v1997_v55  ;;  %1496 = vmatpush.bf16.msra.mxu3 %v2001_v56  ;;  %v2446_v55 = vld [vmem:[%s2935_s11 + $0x2f4] sm:$0xf0]  ;;  %v2438_v56 = vld [vmem:[%s2935_s11 + $0x2bc] sm:$0xf] }
 0x161   : > { %1514 = vmatpush.bf16.msrb.mxu1 %v2005_v60  ;;  %1532 = vmatpush.bf16.msrb.mxu0 %v2009_v3  ;;  %v2213_v59 = vor.u32 %v2446_v55, %v2212_v53  ;;  %v2140_v60 = vld [vmem:[%s2935_s11 + $0x230] sm:$0xf]  ;;  %v2217_v63 = vor.u32 %v2438_v56, %v2214_v57  ;;  %v2358_v56 = vld [vmem:[%s2935_s11 + $0x3c] sm:$0xf] }
 0x162   : > { %v2141_v3 = vor.u32 %v2429_v61, %v2140_v60  ;;  %v1894_v57 = vld [vmem:[%s2935_s11 + $0x78] sm:$0xf0] }
 0x164   : > { %1479 = vmatpush.bf16.msra.mxu2 %v1933_v4  ;;  %1497 = vmatpush.bf16.msra.mxu3 %v1937_v8  ;;  %v2145_v4 = vor.u32 %v2421_v62, %v2142_v0  ;;  %v2153_v8 = vor.u32 %v2422_v6, %v2150_v7 }
 0x165   : > { %1515 = vmatpush.bf16.msrb.mxu1 %v1941_v9  ;;  %1533 = vmatpush.bf16.msrb.mxu0 %v1945_v16  ;;  %v2076_v9 = vld [vmem:[%s2935_s11 + $0x1b0] sm:$0xf]  ;;  %v2081_v16 = vor.u32 %v2405_v11, %v2078_v13 }
 0x166   : > { %v2077_v12 = vor.u32 %v2413_v10, %v2076_v9 }
 0x168   : > { %1480 = vmatpush.bf16.msra.mxu2 %v1869_v17  ;;  %1498 = vmatpush.bf16.msra.mxu3 %v1873_v18  ;;  %v2085_v17 = vor.u32 %v2414_v15, %v2084_v14  ;;  %v2406_v18 = vld [vmem:[%s2935_s11 + $0x1bc] sm:$0xf] }
 0x169   : > { %1516 = vmatpush.bf16.msrb.mxu1 %v1877_v19  ;;  %1534 = vmatpush.bf16.msrb.mxu0 %v1881_v22  ;;  %v2086_v19 = vld [vmem:[%s2935_s11 + $0x1f8] sm:$0xf0]  ;;  %v2397_v22 = vld [vmem:[%s2935_s11 + $0x16c] sm:$0xf0] }
 0x16a   : > { %1409 = vmatmul.bf16.vlgmr.msrb.gmra.mxu2 %v3096_v47  ;;  %1427 = vmatmul.bf16.vlgmr.msrb.gmra.mxu3 %v3096_v47  ;;  %v2089_v21 = vor.u32 %v2406_v18, %v2086_v19  ;;  %v2013_v25 = vor.u32 %v2397_v22, %v2012_v20 }
 0x16b   : > { %1445 = vmatmul.bf16.vlgmr.msra.gmra.mxu1 %v3096_v47  ;;  %1463 = vmatmul.bf16.vlgmr.msra.gmra.mxu0 %v3096_v47 }
 0x16c   : > { %1545 = vmatpush.bf16.msrb.mxu2 %v2333_v26  ;;  %1563 = vmatpush.bf16.msrb.mxu3 %v2337_v30  ;;  %v2017_v26 = vor.u32 %v2389_v23, %v2014_v24  ;;  %v2021_v30 = vor.u32 %v2398_v28, %v2020_v27 }
 0x16d   : > { %1581 = vmatpush.bf16.msra.mxu1 %v2341_v31  ;;  %1599 = vmatpush.bf16.msra.mxu0 %v2345_v35  ;;  %v2022_v31 = vld [vmem:[%s2935_s11 + $0x178] sm:$0xf0]  ;;  %v1950_v35 = vld [vmem:[%s2935_s11 + $0xf0] sm:$0xf0] }
 0x16e   : > { %v2025_v38 = vor.u32 %v2390_v29, %v2022_v31  ;;  %v1953_v43 = vor.u32 %v2373_v34, %v1950_v35 }
 0x170   : > { %1546 = vmatpush.bf16.msrb.mxu2 %v2269_v40  ;;  %1564 = vmatpush.bf16.msrb.mxu3 %v2273_v41  ;;  %v2382_v40 = vld [vmem:[%s2935_s11 + $0xf4] sm:$0xf0]  ;;  %v2374_v41 = vld [vmem:[%s2935_s11 + $0xbc] sm:$0xf] }
 0x171   : > { %1582 = vmatpush.bf16.msra.mxu1 %v2277_v45  ;;  %1600 = vmatpush.bf16.msra.mxu0 %v2281_v50  ;;  %v1957_v44 = vor.u32 %v2382_v40, %v1956_v37  ;;  %v1884_v45 = vld [vmem:[%s2935_s11 + $0x30] sm:$0xf]  ;;  %v1892_v50 = vld [vmem:[%s2935_s11 + $0x38] sm:$0xf]  ;;  %v1961_v52 = vor.u32 %v2374_v41, %v1958_v42 }
 0x172   : > { %v1885_v53 = vor.u32 %v2365_v46, %v1884_v45  ;;  %v1893_v55 = vor.u32 %v2366_v51, %v1892_v50 }
 0x174   : > { %1547 = vmatpush.bf16.msrb.mxu2 %v2205_v54  ;;  %1565 = vmatpush.bf16.msrb.mxu3 %v2209_v58  ;;  %v1889_v54 = vor.u32 %v2357_v48, %v1886_v49  ;;  %v1897_v58 = vor.u32 %v2358_v56, %v1894_v57 }
 0x175   : > { %1583 = vmatpush.bf16.msra.mxu1 %v2213_v59  ;;  %1601 = vmatpush.bf16.msra.mxu0 %v2217_v63  ;;  %v653_v59 = vld [vmem:[%s3265_s21] sm:$0xff] }
 0x176   : > { %v659_v60 = vperm.slane %v653_v59, 2  ;;  %v657_v1 = vperm.slane %v653_v59, 0  ;;  %v658_v2 = vperm.slane %v653_v59, 1  ;;  %v663_v32 = vperm.slane %v653_v59, 6 }
 0x177   : > { %v664_v33 = vperm.slane %v653_v59, 7  ;;  %v662_v40 = vperm.slane %v653_v59, 5 }
 0x178   : > { %1548 = vmatpush.bf16.msrb.mxu2 %v2141_v3  ;;  %1566 = vmatpush.bf16.msrb.mxu3 %v2145_v4 }
 0x179   : > { %1584 = vmatpush.bf16.msra.mxu1 %v2149_v5  ;;  %1602 = vmatpush.bf16.msra.mxu0 %v2153_v8 }
 0x17a   : > { %1414 = vmatmul.bf16.gmra.mxu2 %v3135_v36  ;;  %1432 = vmatmul.bf16.gmra.mxu3 %v3135_v36 }
 0x17b   : > { %1450 = vmatmul.bf16.gmra.mxu1 %v3135_v36  ;;  %1468 = vmatmul.bf16.gmra.mxu0 %v3135_v36 }
 0x17c   : > { %1549 = vmatpush.bf16.msrb.mxu2 %v2077_v12  ;;  %1567 = vmatpush.bf16.msrb.mxu3 %v2081_v16 }
 0x17d   : > { %1585 = vmatpush.bf16.msra.mxu1 %v2085_v17  ;;  %1603 = vmatpush.bf16.msra.mxu0 %v2089_v21 }
 0x180   : > { %1550 = vmatpush.bf16.msrb.mxu2 %v2013_v25  ;;  %1568 = vmatpush.bf16.msrb.mxu3 %v2017_v26 }
 0x181   : > { %1586 = vmatpush.bf16.msra.mxu1 %v2021_v30  ;;  %1604 = vmatpush.bf16.msra.mxu0 %v2025_v38 }
 0x184   : > { %1551 = vmatpush.bf16.msrb.mxu2 %v1949_v39  ;;  %1569 = vmatpush.bf16.msrb.mxu3 %v1953_v43  ;;  %v661_v39 = vperm.slane %v653_v59, 4 }
 0x185   : > { %1587 = vmatpush.bf16.msra.mxu1 %v1957_v44  ;;  %1605 = vmatpush.bf16.msra.mxu0 %v1961_v52 }
 0x188   : > { %1552 = vmatpush.bf16.msrb.mxu2 %v1885_v53  ;;  %1570 = vmatpush.bf16.msrb.mxu3 %v1889_v54 }
 0x189   : > { %1588 = vmatpush.bf16.msra.mxu1 %v1893_v55  ;;  %1606 = vmatpush.bf16.msra.mxu0 %v1897_v58 }
 0x18a   : > { %1481 = vmatmul.bf16.vlgmr.msra.gmra.mxu2 %v3096_v47  ;;  %1499 = vmatmul.bf16.vlgmr.msra.gmra.mxu3 %v3096_v47 }
 0x18b   : > { %1517 = vmatmul.bf16.vlgmr.msrb.gmra.mxu1 %v3096_v47  ;;  %1535 = vmatmul.bf16.vlgmr.msrb.gmra.mxu0 %v3096_v47 }
 0x19a   : > { %1486 = vmatmul.bf16.gmra.mxu2 %v3135_v36  ;;  %1504 = vmatmul.bf16.gmra.mxu3 %v3135_v36 }
 0x19b   : > { %1522 = vmatmul.bf16.gmra.mxu1 %v3135_v36  ;;  %1540 = vmatmul.bf16.gmra.mxu0 %v3135_v36 }
 0x1aa   : > { %1553 = vmatmul.bf16.vlgmr.msrb.gmra.mxu2 %v3096_v47  ;;  %1571 = vmatmul.bf16.vlgmr.msrb.gmra.mxu3 %v3096_v47 }
 0x1ab   : > { %1589 = vmatmul.bf16.vlgmr.msra.gmra.mxu1 %v3096_v47  ;;  %1607 = vmatmul.bf16.vlgmr.msra.gmra.mxu0 %v3096_v47  ;;  %v660_v47 = vperm.slane %v653_v59, 3 }
 0x1ba   : > { %1558 = vmatmul.bf16.gmra.mxu2 %v3135_v36  ;;  %1576 = vmatmul.bf16.gmra.mxu3 %v3135_v36 }
 0x1bb   : > { %1594 = vmatmul.bf16.gmra.mxu1 %v3135_v36  ;;  %1612 = vmatmul.bf16.gmra.mxu0 %v3135_v36 }
 0x1c8   : > { %v1374_v61 = vpop.f32.mrf.mxu1  ;;  %v1392_v62 = vpop.f32.mrf.mxu0 }
 0x1c9   : > { %v1375_v63 = vadd.f32 %v1374_v61, %v659_v60  ;;  %v1393_v0 = vadd.f32 %v1392_v62, %v660_v47 }
 0x1cb   : > { %v1618_v3 = vpack.c.bf16 %v1393_v0, %v1375_v63 }
 0x1cd   : > { %1642 = vst [vmem:[%s3269_s4 + $0x8] sm:$0xff] %v1618_v3  ;;  %v1338_v36 = vpop.f32.mrf.mxu2  ;;  %v1356_v4 = vpop.f32.mrf.mxu3 }
 0x1ce   : > { %v1339_v5 = vadd.f32 %v1338_v36, %v657_v1  ;;  %v1357_v6 = vadd.f32 %v1356_v4, %v658_v2  ;;  %v654_v4 = vld [vmem:[%s3265_s21 + $0x8] sm:$0xff] }
 0x1d0   : > { %v1617_v7 = vpack.c.bf16 %v1357_v6, %v1339_v5  ;;  %v1376_v8 = vpop.f32.mrf.mxu1  ;;  %v1394_v9 = vpop.f32.mrf.mxu0 }
 0x1d1   : > { %v1377_v10 = vadd.f32 %v1376_v8, %v659_v60  ;;  %v1395_v11 = vadd.f32 %v1394_v9, %v660_v47  ;;  %v668_v8 = vperm.slane %v654_v4, 3 }
 0x1d2   : > { %1641 = vst [vmem:[%s3269_s4] sm:$0xff] %v1617_v7  ;;  %v667_v7 = vperm.slane %v654_v4, 2 }
 0x1d3   : > { %v1626_v12 = vpack.c.bf16 %v1395_v11, %v1377_v10 }
 0x1d5   : > { %1650 = vst [vmem:[%s3269_s4 + $0x48] sm:$0xff] %v1626_v12  ;;  %v1340_v13 = vpop.f32.mrf.mxu2  ;;  %v1358_v14 = vpop.f32.mrf.mxu3 }
 0x1d6   : > { %v1341_v15 = vadd.f32 %v1340_v13, %v657_v1  ;;  %v1359_v16 = vadd.f32 %v1358_v14, %v658_v2  ;;  %v665_v13 = vperm.slane %v654_v4, 0  ;;  %v666_v14 = vperm.slane %v654_v4, 1 }
 0x1d8   : > { %v1625_v17 = vpack.c.bf16 %v1359_v16, %v1341_v15  ;;  %v1379_v18 = vpop.f32.mrf.mxu1  ;;  %v1397_v19 = vpop.f32.mrf.mxu0 }
 0x1d9   : > { %v1380_v20 = vadd.f32 %v1379_v18, %v659_v60  ;;  %v1398_v21 = vadd.f32 %v1397_v19, %v660_v47 }
 0x1da   : > { %1649 = vst [vmem:[%s3269_s4 + $0x40] sm:$0xff] %v1625_v17 }
 0x1db   : > { %v1634_v22 = vpack.c.bf16 %v1398_v21, %v1380_v20 }
 0x1dd   : > { %1658 = vst [vmem:[%s3269_s4 + $0x88] sm:$0xff] %v1634_v22  ;;  %v1343_v23 = vpop.f32.mrf.mxu2  ;;  %v1361_v24 = vpop.f32.mrf.mxu3 }
 0x1de   : > { %v1344_v25 = vadd.f32 %v1343_v23, %v657_v1  ;;  %v1362_v26 = vadd.f32 %v1361_v24, %v658_v2 }
 0x1e0   : > { %v1633_v27 = vpack.c.bf16 %v1362_v26, %v1344_v25  ;;  %v1381_v28 = vpop.f32.mrf.mxu1  ;;  %v1399_v29 = vpop.f32.mrf.mxu0 }
 0x1e2   : > { %1657 = vst [vmem:[%s3269_s4 + $0x80] sm:$0xff] %v1633_v27 }
 0x1e5   : > { %v1345_v30 = vpop.f32.mrf.mxu2  ;;  %v1363_v31 = vpop.f32.mrf.mxu3 }
 0x1e8   : > { %v1446_v34 = vpop.f32.mrf.mxu1  ;;  %v1464_v35 = vpop.f32.mrf.mxu0 }
 0x1e9   : > { %v1447_v37 = vadd.f32 %v1446_v34, %v663_v32  ;;  %v1465_v38 = vadd.f32 %v1464_v35, %v664_v33 }
 0x1eb   : > { %v1620_v41 = vpack.c.bf16 %v1465_v38, %v1447_v37 }
 0x1ed   : > { %1644 = vst [vmem:[%s3269_s4 + $0x18] sm:$0xff] %v1620_v41  ;;  %v1410_v42 = vpop.f32.mrf.mxu2  ;;  %v1428_v43 = vpop.f32.mrf.mxu3 }
 0x1ee   : > { %v1411_v44 = vadd.f32 %v1410_v42, %v661_v39  ;;  %v1429_v45 = vadd.f32 %v1428_v43, %v662_v40 }
 0x1f0   : > { %v1619_v46 = vpack.c.bf16 %v1429_v45, %v1411_v44  ;;  %v1448_v48 = vpop.f32.mrf.mxu1  ;;  %v1466_v49 = vpop.f32.mrf.mxu0 }
 0x1f1   : > { %v1449_v50 = vadd.f32 %v1448_v48, %v663_v32  ;;  %v1467_v51 = vadd.f32 %v1466_v49, %v664_v33  ;;  %v672_v48 = vperm.slane %v654_v4, 7 }
 0x1f2   : > { %1643 = vst [vmem:[%s3269_s4 + $0x10] sm:$0xff] %v1619_v46  ;;  %v671_v46 = vperm.slane %v654_v4, 6 }
 0x1f3   : > { %v1628_v52 = vpack.c.bf16 %v1467_v51, %v1449_v50 }
 0x1f5   : > { %1652 = vst [vmem:[%s3269_s4 + $0x58] sm:$0xff] %v1628_v52  ;;  %v1412_v53 = vpop.f32.mrf.mxu2  ;;  %v1430_v54 = vpop.f32.mrf.mxu3 }
 0x1f6   : > { %v1413_v55 = vadd.f32 %v1412_v53, %v661_v39  ;;  %v1431_v56 = vadd.f32 %v1430_v54, %v662_v40  ;;  %v669_v53 = vperm.slane %v654_v4, 4  ;;  %v670_v54 = vperm.slane %v654_v4, 5 }
 0x1f8   : > { %v1627_v57 = vpack.c.bf16 %v1431_v56, %v1413_v55  ;;  %v1451_v58 = vpop.f32.mrf.mxu1  ;;  %v1469_v59 = vpop.f32.mrf.mxu0 }
 0x1f9   : > { %v1452_v60 = vadd.f32 %v1451_v58, %v663_v32  ;;  %v1470_v47 = vadd.f32 %v1469_v59, %v664_v33 }
 0x1fa   : > { %1651 = vst [vmem:[%s3269_s4 + $0x50] sm:$0xff] %v1627_v57 }
 0x1fb   : > { %v1636_v61 = vpack.c.bf16 %v1470_v47, %v1452_v60 }
 0x1fd   : > { %1660 = vst [vmem:[%s3269_s4 + $0x98] sm:$0xff] %v1636_v61  ;;  %v1415_v62 = vpop.f32.mrf.mxu2  ;;  %v1433_v63 = vpop.f32.mrf.mxu3 }
 0x1fe   : > { %v1416_v0 = vadd.f32 %v1415_v62, %v661_v39  ;;  %v1434_v1 = vadd.f32 %v1433_v63, %v662_v40 }
 0x200   : > { %v1635_v2 = vpack.c.bf16 %v1434_v1, %v1416_v0  ;;  %v1453_v3 = vpop.f32.mrf.mxu1  ;;  %v1471_v36 = vpop.f32.mrf.mxu0 }
 0x202   : > { %1659 = vst [vmem:[%s3269_s4 + $0x90] sm:$0xff] %v1635_v2 }
 0x205   : > { %v1417_v5 = vpop.f32.mrf.mxu2  ;;  %v1435_v6 = vpop.f32.mrf.mxu3 }
 0x208   : > { %v1518_v9 = vpop.f32.mrf.mxu1  ;;  %v1536_v10 = vpop.f32.mrf.mxu0 }
 0x209   : > { %v1519_v11 = vadd.f32 %v1518_v9, %v667_v7  ;;  %v1537_v12 = vadd.f32 %v1536_v10, %v668_v8 }
 0x20b   : > { %v1622_v15 = vpack.c.bf16 %v1537_v12, %v1519_v11 }
 0x20d   : > { %1646 = vst [vmem:[%s3269_s4 + $0x28] sm:$0xff] %v1622_v15  ;;  %v1482_v16 = vpop.f32.mrf.mxu2  ;;  %v1500_v17 = vpop.f32.mrf.mxu3 }
 0x20e   : > { %v1483_v18 = vadd.f32 %v1482_v16, %v665_v13  ;;  %v1501_v19 = vadd.f32 %v1500_v17, %v666_v14 }
 0x210   : > { %v1621_v20 = vpack.c.bf16 %v1501_v19, %v1483_v18  ;;  %v1520_v21 = vpop.f32.mrf.mxu1  ;;  %v1538_v22 = vpop.f32.mrf.mxu0 }
 0x211   : > { %v1521_v23 = vadd.f32 %v1520_v21, %v667_v7  ;;  %v1539_v24 = vadd.f32 %v1538_v22, %v668_v8 }
 0x212   : > { %1645 = vst [vmem:[%s3269_s4 + $0x20] sm:$0xff] %v1621_v20 }
 0x213   : > { %v1630_v25 = vpack.c.bf16 %v1539_v24, %v1521_v23 }
 0x215   : > { %1654 = vst [vmem:[%s3269_s4 + $0x68] sm:$0xff] %v1630_v25  ;;  %v1484_v26 = vpop.f32.mrf.mxu2  ;;  %v1502_v27 = vpop.f32.mrf.mxu3 }
 0x216   : > { %v1485_v28 = vadd.f32 %v1484_v26, %v665_v13  ;;  %v1503_v29 = vadd.f32 %v1502_v27, %v666_v14 }
 0x218   : > { %v1629_v30 = vpack.c.bf16 %v1503_v29, %v1485_v28  ;;  %v1523_v31 = vpop.f32.mrf.mxu1  ;;  %v1541_v32 = vpop.f32.mrf.mxu0 }
 0x219   : > { %v1524_v33 = vadd.f32 %v1523_v31, %v667_v7  ;;  %v1542_v34 = vadd.f32 %v1541_v32, %v668_v8 }
 0x21a   : > { %1653 = vst [vmem:[%s3269_s4 + $0x60] sm:$0xff] %v1629_v30 }
 0x21b   : > { %v1638_v35 = vpack.c.bf16 %v1542_v34, %v1524_v33 }
 0x21d   : > { %1662 = vst [vmem:[%s3269_s4 + $0xa8] sm:$0xff] %v1638_v35  ;;  %v1487_v37 = vpop.f32.mrf.mxu2  ;;  %v1505_v38 = vpop.f32.mrf.mxu3 }
 0x21e   : > { %v1488_v39 = vadd.f32 %v1487_v37, %v665_v13  ;;  %v1506_v40 = vadd.f32 %v1505_v38, %v666_v14 }
 0x220   : > { %v1637_v41 = vpack.c.bf16 %v1506_v40, %v1488_v39  ;;  %v1525_v42 = vpop.f32.mrf.mxu1  ;;  %v1543_v43 = vpop.f32.mrf.mxu0 }
 0x222   : > { %1661 = vst [vmem:[%s3269_s4 + $0xa0] sm:$0xff] %v1637_v41 }
 0x225   : > { %v1489_v44 = vpop.f32.mrf.mxu2  ;;  %v1507_v45 = vpop.f32.mrf.mxu3 }
 0x228   : > { %v1590_v49 = vpop.f32.mrf.mxu1  ;;  %v1608_v50 = vpop.f32.mrf.mxu0 }
 0x229   : > { %v1591_v51 = vadd.f32 %v1590_v49, %v671_v46  ;;  %v1609_v52 = vadd.f32 %v1608_v50, %v672_v48 }
 0x22b   : > { %v1624_v55 = vpack.c.bf16 %v1609_v52, %v1591_v51 }
 0x22d   : > { %1648 = vst [vmem:[%s3269_s4 + $0x38] sm:$0xff] %v1624_v55  ;;  %v1554_v56 = vpop.f32.mrf.mxu2  ;;  %v1572_v57 = vpop.f32.mrf.mxu3 }
 0x22e   : > { %v1555_v58 = vadd.f32 %v1554_v56, %v669_v53  ;;  %v1573_v59 = vadd.f32 %v1572_v57, %v670_v54 }
 0x230   : > { %v1623_v60 = vpack.c.bf16 %v1573_v59, %v1555_v58  ;;  %v1592_v47 = vpop.f32.mrf.mxu1  ;;  %v1610_v61 = vpop.f32.mrf.mxu0 }
 0x231   : > { %v1593_v62 = vadd.f32 %v1592_v47, %v671_v46  ;;  %v1611_v63 = vadd.f32 %v1610_v61, %v672_v48 }
 0x232   : > { %1647 = vst [vmem:[%s3269_s4 + $0x30] sm:$0xff] %v1623_v60 }
 0x233   : > { %v1632_v0 = vpack.c.bf16 %v1611_v63, %v1593_v62 }
 0x235   : > { %1656 = vst [vmem:[%s3269_s4 + $0x78] sm:$0xff] %v1632_v0  ;;  %v1556_v1 = vpop.f32.mrf.mxu2  ;;  %v1574_v2 = vpop.f32.mrf.mxu3 }
 0x236   : > { %v1557_v3 = vadd.f32 %v1556_v1, %v669_v53  ;;  %v1575_v36 = vadd.f32 %v1574_v2, %v670_v54 }
 0x238   : > { %v1631_v4 = vpack.c.bf16 %v1575_v36, %v1557_v3  ;;  %v1595_v5 = vpop.f32.mrf.mxu1  ;;  %v1613_v6 = vpop.f32.mrf.mxu0 }
 0x239   : > { %v1596_v7 = vadd.f32 %v1595_v5, %v671_v46  ;;  %v1614_v8 = vadd.f32 %v1613_v6, %v672_v48 }
 0x23a   : > { %1655 = vst [vmem:[%s3269_s4 + $0x70] sm:$0xff] %v1631_v4 }
 0x23b   : > { %v1640_v9 = vpack.c.bf16 %v1614_v8, %v1596_v7 }
 0x23d   : > { %1664 = vst [vmem:[%s3269_s4 + $0xb8] sm:$0xff] %v1640_v9  ;;  %v1559_v10 = vpop.f32.mrf.mxu2  ;;  %v1577_v11 = vpop.f32.mrf.mxu3 }
 0x23e   : > { %v1560_v12 = vadd.f32 %v1559_v10, %v669_v53  ;;  %v1578_v13 = vadd.f32 %v1577_v11, %v670_v54 }
 0x240   : > { %v1639_v14 = vpack.c.bf16 %v1578_v13, %v1560_v12  ;;  %v1597_v15 = vpop.f32.mrf.mxu1  ;;  %v1615_v16 = vpop.f32.mrf.mxu0 }
 0x242   : > { %1663 = vst [vmem:[%s3269_s4 + $0xb0] sm:$0xff] %v1639_v14 }
 0x243   : > { %2703 = shalt.err (!%p2700_p2)
}
 0x244   : > { %s2777_s7 = smov 1024   ;;  %s2778_s13 = smov 2048  }
 0x245   : > { %s2779_s21 = smov 64   ;;  %v1561_v17 = vpop.f32.mrf.mxu2  ;;  %v1579_v18 = vpop.f32.mrf.mxu3 }
 0x246   : > { %2491 = dma.vmem_to_hbm [thread:$0]  (%p2871_p8), %s1682_s30, 3072, %s1684_s17, %s1666_s27, %s2777_s7, %s2778_s13, %s2779_s21  }
 0x247 PF: > { %s3367_s14 = sld [smem:[#allocation13_spill]]  ;;  %p2505_p5 = pnand %p1817_p1, %p2876_p10 }
 0x248   : > { %s3369_s24 = sld [smem:[#allocation14_spill]] }
 0x249   : > { %p2506_p7 = pneg %p2505_p5 }
 0x24d   : > { %s1698_s29 = sand.u32 1, %s3367_s14  }
 0x24e   : > { %s1699_s11 = scalar_lea.sflag [#allocation4], %s1698_s29 }
 0x24f   : > { %2741 = dma.done.wait (%p2506_p7), %s1699_s11, 3072  }
 0x250   : > { %2743 = vsyncadd (%p2506_p7), %s1699_s11, 4294964224  ;;  %s22_s29 = sadd.s32 1, %s3369_s24   ;;  %s3370_s24 = smov %s2750_s25 }
 0x251   : > { %p19_p4 = scmp.ge.s32.totalorder %s22_s29, 4   ;;  %s3371_s25 = smov %s2754_s26 }
 0x252   : > { %s3372_s26 = smov %s2916_s12  ;;  %s3373_s27 = smov %s2762_s28 }
 0x253   : > { %s3374_s28 = smov %s3376_s3  ;;  %21 = sbr.rel (!%p19_p4) target bundleno = 10 (0xa), region = 106 }
 0x258   :  { %1705 = vsyncpa [#allocation3], 1 }
 0x259   :  { %1707 = vsyncpa [#allocation3 + $0x1], 1 }
 0x25a   :  { %1708 = vsyncpa [#allocation6], 1 }
 0x25b   :  { %1709 = vsyncpa [#allocation4], 1 }
 0x25c   :  { %1711 = vsyncpa [#allocation4 + $0x1], 1 }

</bundles_post_ra>
